<compile_context>
chip_gen: v5e
topology: v5e:2x2
jax: 0.10.0
libtpu: 0.0.40
codegen_flags: <defaults>
</compile_context>

<pallas_src>
import math

import jax
import jax.numpy as jnp
import numpy as np
from jax.experimental import pallas as pl
from jax.experimental.pallas import tpu as pltpu

# ----------------------------- hyperparameters --------------------------------
B = 2           # batch
T = 8           # decoder (target) sequence length
S = 8           # encoder (source) sequence length
D = 32          # d_model
H = 4           # n_heads
HD = D // H     # head_dim
F = 64          # d_ff
SCALE = math.sqrt(HD)
LN_EPS = 1e-5
NEG_BIG = -1e30   # additive mask value; exp() underflows to exactly 0 in f32


# ------------------------------ Pallas kernel ----------------------------------
def decoder_layer_kernel(x_ref, enc_ref, tbias_ref, sbias_ref,
                         wqkv_ref, bqkv_ref, wo_self_ref, wo_cross_ref, bo_ref,
                         w1_ref, b1_ref, w2_ref, b2_ref,
                         lng_ref, lnb_ref, out_ref):
    # fused [batch*seq, d_model] activation slabs
    x = x_ref[...]              # [B*T, D]
    enc = enc_ref[...]          # [B*S, D]
    bqkv = bqkv_ref[...]        # [6, D]
    bo = bo_ref[...]            # [2, D]
    lng = lng_ref[...]          # [3, D]
    lnb = lnb_ref[...]          # [3, D]

    def layer_norm(v, i):
        mean = jnp.mean(v, axis=-1, keepdims=True)
        cen = v - mean
        var = jnp.mean(cen * cen, axis=-1, keepdims=True)
        return cen * jax.lax.rsqrt(var + LN_EPS) * lng[i:i + 1] + lnb[i:i + 1]

    def split_heads(z, n):
        # [B*n, D] -> [B*H, n, HD], rows ordered (batch-major, head-minor).
        # Static slices stacked on a NEW leading axis: no lane concatenate and
        # no leading/tiled-dim-mixing transpose.
        return jnp.stack([z[b * n:(b + 1) * n, h * HD:(h + 1) * HD]
                          for b in range(B) for h in range(H)], axis=0)

    def mha(q_in, kv_in, nq, nk, bias, base, wo_bh, bo_row):
        # q/k/v projections on the fused slab; 1/sqrt(head_dim) is pre-folded
        # into the query weights/bias in the wrapper.
        q = jnp.dot(q_in, wqkv_ref[base + 0],
                    preferred_element_type=jnp.float32) + bqkv[base + 0:base + 1]
        k = jnp.dot(kv_in, wqkv_ref[base + 1],
                    preferred_element_type=jnp.float32) + bqkv[base + 1:base + 2]
        v = jnp.dot(kv_in, wqkv_ref[base + 2],
                    preferred_element_type=jnp.float32) + bqkv[base + 2:base + 3]
        qh = split_heads(q, nq)                      # [B*H, nq, HD]
        kh = split_heads(k, nk)                      # [B*H, nk, HD]
        vh = split_heads(v, nk)                      # [B*H, nk, HD]

        # batched QK^T over the fused (batch*head) axis -- no explicit .T
        e = jnp.einsum('bqd,bkd->bqk', qh, kh,
                       preferred_element_type=jnp.float32) + bias   # [B*H, nq, nk]
        m = jnp.max(e, axis=-1, keepdims=True)
        p = jnp.exp(e - m)
        # softmax denominator on the EUP (approximate reciprocal)
        p = p * pl.reciprocal(jnp.sum(p, axis=-1, keepdims=True), approx=True)
        # TODO(synk): attention-prob dropout is identity in eval mode.

        ctx = jnp.einsum('bqk,bkd->bqd', p, vh,
                         preferred_element_type=jnp.float32)        # [B*H, nq, HD]
        # per-head output projection, accumulated over heads (no lane concat)
        oh = jnp.einsum('bqd,bdo->bqo', ctx, wo_bh,
                        preferred_element_type=jnp.float32)         # [B*H, nq, D]
        oh = oh.reshape(B, H, nq, D)                 # leading-dim reshape only
        o = oh[:, 0]
        for hh in range(1, H):
            o = o + oh[:, hh]
        return o.reshape(B * nq, D) + bo_row

    # --- residual block 1: masked self-attention --------------------------------
    a1 = mha(x, x, T, T, tbias_ref[...], 0, wo_self_ref[...], bo[0:1])
    x1 = layer_norm(x + a1, 0)

    # --- residual block 2: encoder-decoder cross-attention ----------------------
    a2 = mha(x1, enc, T, S, sbias_ref[...], 3, wo_cross_ref[...], bo[1:2])
    x2 = layer_norm(x1 + a2, 1)

    # --- residual block 3: position-wise feed-forward ---------------------------
    hid = jnp.maximum(jnp.dot(x2, w1_ref[...],
                              preferred_element_type=jnp.float32) + b1_ref[...], 0.0)
    ff = jnp.dot(hid, w2_ref[...],
                 preferred_element_type=jnp.float32) + b2_ref[...]
    # TODO(synk): FFN / residual dropouts are identity in eval mode.
    out_ref[...] = layer_norm(x2 + ff, 2)


# -------------------------------- wrapper --------------------------------------
@jax.jit
def decoder_layer(x, enc, tmask, smask, params):
    """x: [B,T,D], enc: [B,S,D], tmask: [B,T,T], smask: [B,T,S] (1=keep, 0=mask)."""
    w_attn, b_attn, w1, b1, w2, b2, ln_g, ln_b = params

    inv_scale = jnp.float32(1.0 / SCALE)
    # pack q,k,v projections [self q,k,v, cross q,k,v]; fold 1/sqrt(head_dim) into q
    wqkv = jnp.stack([w_attn[0] * inv_scale, w_attn[1], w_attn[2],
                      w_attn[4] * inv_scale, w_attn[5], w_attn[6]])
    bqkv = jnp.stack([b_attn[0] * inv_scale, b_attn[1], b_attn[2],
                      b_attn[4] * inv_scale, b_attn[5], b_attn[6]])
    # output projections split per head and tiled over batch: [B*H, HD, D]
    wo_self = jnp.tile(w_attn[3].reshape(H, HD, D), (B, 1, 1))
    wo_cross = jnp.tile(w_attn[7].reshape(H, HD, D), (B, 1, 1))
    bo = jnp.stack([b_attn[3], b_attn[7]])                      # [2, D]
    # additive mask biases, one row per fused (batch, head): [B*H, T, Tk]
    tbias = jnp.repeat(jnp.where(tmask == 0.0, NEG_BIG, 0.0).astype(jnp.float32),
                       H, axis=0)
    sbias = jnp.repeat(jnp.where(smask == 0.0, NEG_BIG, 0.0).astype(jnp.float32),
                       H, axis=0)

    x2d = x.reshape(B * T, D)
    enc2d = enc.reshape(B * S, D)

    out2d = pl.pallas_call(
        decoder_layer_kernel,
        out_shape=jax.ShapeDtypeStruct((B * T, D), jnp.float32),
        grid_spec=pltpu.PrefetchScalarGridSpec(
            num_scalar_prefetch=0,
            grid=(1,),                                   # single fused invocation
            in_specs=[
                pl.BlockSpec((B * T, D), lambda i: (0, 0)),          # x slab
                pl.BlockSpec((B * S, D), lambda i: (0, 0)),          # enc slab
                pl.BlockSpec((B * H, T, T), lambda i: (0, 0, 0)),    # self-attn bias
                pl.BlockSpec((B * H, T, S), lambda i: (0, 0, 0)),    # cross-attn bias
                pl.BlockSpec((6, D, D), lambda i: (0, 0, 0)),        # q/k/v weights
                pl.BlockSpec((6, D), lambda i: (0, 0)),              # q/k/v biases
                pl.BlockSpec((B * H, HD, D), lambda i: (0, 0, 0)),   # self W_o per head
                pl.BlockSpec((B * H, HD, D), lambda i: (0, 0, 0)),   # cross W_o per head
                pl.BlockSpec((2, D), lambda i: (0, 0)),              # output-proj biases
                pl.BlockSpec((D, F), lambda i: (0, 0)),              # FFN W1
                pl.BlockSpec((1, F), lambda i: (0, 0)),              # FFN b1
                pl.BlockSpec((F, D), lambda i: (0, 0)),              # FFN W2
                pl.BlockSpec((1, D), lambda i: (0, 0)),              # FFN b2
                pl.BlockSpec((3, D), lambda i: (0, 0)),              # LN gammas
                pl.BlockSpec((3, D), lambda i: (0, 0)),              # LN betas
            ],
            out_specs=pl.BlockSpec((B * T, D), lambda i: (0, 0)),
        ),
        compiler_params=pltpu.CompilerParams(dimension_semantics=("arbitrary",)),
    )(x2d, enc2d, tbias, sbias, wqkv, bqkv, wo_self, wo_cross, bo,
      w1, b1.reshape(1, F), w2, b2.reshape(1, D), ln_g, ln_b)
    return out2d.reshape(B, T, D)


# ----------------------------- pure-JAX reference ------------------------------
def ref_mha(q, k, v, mask, wq, bq, wk, bk, wv, bv, wo, bo):
    bsz, tq, _ = q.shape
    tk = k.shape[1]
    Q = (q @ wq + bq).reshape(bsz, tq, H, HD).transpose(0, 2, 1, 3)
    K = (k @ wk + bk).reshape(bsz, tk, H, HD).transpose(0, 2, 1, 3)
    V = (v @ wv + bv).reshape(bsz, tk, H, HD).transpose(0, 2, 1, 3)
    energy = jnp.einsum('bhqd,bhkd->bhqk', Q, K) / SCALE
    energy = jnp.where(mask[:, None, :, :] == 0.0, -jnp.inf, energy)
    attn = jax.nn.softmax(energy, axis=-1)
    o = jnp.einsum('bhqk,bhkd->bhqd', attn, V).transpose(0, 2, 1, 3).reshape(bsz, tq, D)
    return o @ wo + bo


def ref_ln(v, g, b):
    mean = jnp.mean(v, axis=-1, keepdims=True)
    var = jnp.mean((v - mean) ** 2, axis=-1, keepdims=True)
    return (v - mean) / jnp.sqrt(var + LN_EPS) * g + b


def ref_decoder_layer(x, enc, tmask, smask, params):
    w_attn, b_attn, w1, b1, w2, b2, ln_g, ln_b = params
    a1 = ref_mha(x, x, x, tmask, w_attn[0], b_attn[0], w_attn[1], b_attn[1],
                 w_attn[2], b_attn[2], w_attn[3], b_attn[3])
    x1 = ref_ln(x + a1, ln_g[0], ln_b[0])
    a2 = ref_mha(x1, enc, enc, smask, w_attn[4], b_attn[4], w_attn[5], b_attn[5],
                 w_attn[6], b_attn[6], w_attn[7], b_attn[7])
    x2 = ref_ln(x1 + a2, ln_g[1], ln_b[1])
    ff = jnp.maximum(x2 @ w1 + b1, 0.0) @ w2 + b2
    return ref_ln(x2 + ff, ln_g[2], ln_b[2])


# ------------------------------------ main -------------------------------------
if __name__ == "__main__":
    key = jax.random.PRNGKey(0)
    keys = jax.random.split(key, 8)

    def uinit(k, shape, fan_in):
        bound = 1.0 / math.sqrt(fan_in)
        return jax.random.uniform(k, shape, jnp.float32, -bound, bound)

    # attention params packed [self q,k,v,o, cross q,k,v,o]; weights stored [in, out]
    w_attn = uinit(keys[0], (8, D, D), D)
    b_attn = uinit(keys[1], (8, D), D)
    w1 = uinit(keys[2], (D, F), D)
    b1 = uinit(keys[3], (F,), D)
    w2 = uinit(keys[4], (F, D), F)
    b2 = uinit(keys[5], (D,), F)
    ln_g = jnp.ones((3, D), jnp.float32)
    ln_b = jnp.zeros((3, D), jnp.float32)
    params = (w_attn, b_attn, w1, b1, w2, b2, ln_g, ln_b)

    x = jax.random.normal(keys[6], (B, T, D), jnp.float32)
    enc = jax.random.normal(keys[7], (B, S, D), jnp.float32)

    # target mask: causal; source mask: last two encoder positions masked for batch 1
    tmask = jnp.broadcast_to(jnp.tril(jnp.ones((T, T), jnp.float32)), (B, T, T))
    smask = jnp.ones((B, T, S), jnp.float32).at[1, :, S - 2:].set(0.0)

    out = jax.block_until_ready(decoder_layer(x, enc, tmask, smask, params))
    ref = ref_decoder_layer(x, enc, tmask, smask, params)

    # 5e-3 covers the EUP approximate-reciprocal softmax normalization
    # (all other math is f32 and matches the reference to ~1e-6).
    np.testing.assert_allclose(np.asarray(out), np.asarray(ref), atol=5e-3, rtol=5e-3)

    print("KERNEL_OK")
</pallas_src>

<mosaic_0001>
module attributes {stable_mosaic.version = 11 : i64} {
  func.func @decoder_layer_kernel(%arg0: i32, %arg1: memref<16x32xf32, #tpu.memory_space<vmem>>, %arg2: memref<16x32xf32, #tpu.memory_space<vmem>>, %arg3: memref<8x8x8xf32, #tpu.memory_space<vmem>>, %arg4: memref<8x8x8xf32, #tpu.memory_space<vmem>>, %arg5: memref<6x32x32xf32, #tpu.memory_space<vmem>>, %arg6: memref<6x32xf32, #tpu.memory_space<vmem>>, %arg7: memref<8x8x32xf32, #tpu.memory_space<vmem>>, %arg8: memref<8x8x32xf32, #tpu.memory_space<vmem>>, %arg9: memref<2x32xf32, #tpu.memory_space<vmem>>, %arg10: memref<32x64xf32, #tpu.memory_space<vmem>>, %arg11: memref<1x64xf32, #tpu.memory_space<vmem>>, %arg12: memref<64x32xf32, #tpu.memory_space<vmem>>, %arg13: memref<1x32xf32, #tpu.memory_space<vmem>>, %arg14: memref<3x32xf32, #tpu.memory_space<vmem>>, %arg15: memref<3x32xf32, #tpu.memory_space<vmem>>, %arg16: memref<16x32xf32, #tpu.memory_space<vmem>>) attributes {dimension_semantics = [#tpu.dimension_semantics<arbitrary>], iteration_bounds = array<i64: 1>, scalar_prefetch = 0 : i64, scratch_operands = 0 : i64, tpu.core_type = #tpu.core_type<tc>, window_params = [{pipeline_mode = #tpu.pipeline_mode<synchronous>, transform_indices = @transform_0, window_bounds = array<i64: 16, 32>}, {pipeline_mode = #tpu.pipeline_mode<synchronous>, transform_indices = @transform_1, window_bounds = array<i64: 16, 32>}, {pipeline_mode = #tpu.pipeline_mode<synchronous>, transform_indices = @transform_2, window_bounds = array<i64: 8, 8, 8>}, {pipeline_mode = #tpu.pipeline_mode<synchronous>, transform_indices = @transform_3, window_bounds = array<i64: 8, 8, 8>}, {pipeline_mode = #tpu.pipeline_mode<synchronous>, transform_indices = @transform_4, window_bounds = array<i64: 6, 32, 32>}, {pipeline_mode = #tpu.pipeline_mode<synchronous>, transform_indices = @transform_5, window_bounds = array<i64: 6, 32>}, {pipeline_mode = #tpu.pipeline_mode<synchronous>, transform_indices = @transform_6, window_bounds = array<i64: 8, 8, 32>}, {pipeline_mode = #tpu.pipeline_mode<synchronous>, transform_indices = @transform_7, window_bounds = array<i64: 8, 8, 32>}, {pipeline_mode = #tpu.pipeline_mode<synchronous>, transform_indices = @transform_8, window_bounds = array<i64: 2, 32>}, {pipeline_mode = #tpu.pipeline_mode<synchronous>, transform_indices = @transform_9, window_bounds = array<i64: 32, 64>}, {pipeline_mode = #tpu.pipeline_mode<synchronous>, transform_indices = @transform_10, window_bounds = array<i64: 1, 64>}, {pipeline_mode = #tpu.pipeline_mode<synchronous>, transform_indices = @transform_11, window_bounds = array<i64: 64, 32>}, {pipeline_mode = #tpu.pipeline_mode<synchronous>, transform_indices = @transform_12, window_bounds = array<i64: 1, 32>}, {pipeline_mode = #tpu.pipeline_mode<synchronous>, transform_indices = @transform_13, window_bounds = array<i64: 3, 32>}, {pipeline_mode = #tpu.pipeline_mode<synchronous>, transform_indices = @transform_14, window_bounds = array<i64: 3, 32>}, {pipeline_mode = #tpu.pipeline_mode<synchronous>, transform_indices = @transform_15, window_bounds = array<i64: 16, 32>}]} {
    %c0 = arith.constant 0 : index
    %c0_0 = arith.constant 0 : index
    %0 = vector.load %arg1[%c0, %c0_0] : memref<16x32xf32, #tpu.memory_space<vmem>>, vector<16x32xf32>
    %c0_1 = arith.constant 0 : index
    %c0_2 = arith.constant 0 : index
    %1 = vector.load %arg2[%c0_1, %c0_2] : memref<16x32xf32, #tpu.memory_space<vmem>>, vector<16x32xf32>
    %c0_3 = arith.constant 0 : index
    %c0_4 = arith.constant 0 : index
    %2 = vector.load %arg6[%c0_3, %c0_4] : memref<6x32xf32, #tpu.memory_space<vmem>>, vector<6x32xf32>
    %c0_5 = arith.constant 0 : index
    %c0_6 = arith.constant 0 : index
    %3 = vector.load %arg9[%c0_5, %c0_6] : memref<2x32xf32, #tpu.memory_space<vmem>>, vector<2x32xf32>
    %c0_7 = arith.constant 0 : index
    %c0_8 = arith.constant 0 : index
    %4 = vector.load %arg14[%c0_7, %c0_8] : memref<3x32xf32, #tpu.memory_space<vmem>>, vector<3x32xf32>
    %c0_9 = arith.constant 0 : index
    %c0_10 = arith.constant 0 : index
    %5 = vector.load %arg15[%c0_9, %c0_10] : memref<3x32xf32, #tpu.memory_space<vmem>>, vector<3x32xf32>
    %c0_11 = arith.constant 0 : index
    %c0_12 = arith.constant 0 : index
    %c0_13 = arith.constant 0 : index
    %6 = vector.load %arg3[%c0_11, %c0_12, %c0_13] : memref<8x8x8xf32, #tpu.memory_space<vmem>>, vector<8x8x8xf32>
    %c0_14 = arith.constant 0 : index
    %c0_15 = arith.constant 0 : index
    %c0_16 = arith.constant 0 : index
    %7 = vector.load %arg7[%c0_14, %c0_15, %c0_16] : memref<8x8x32xf32, #tpu.memory_space<vmem>>, vector<8x8x32xf32>
    %8 = vector.extract_strided_slice %3 {offsets = [0, 0], sizes = [1, 32], strides = [1, 1]} : vector<2x32xf32> to vector<1x32xf32>
    %c0_17 = arith.constant 0 : index
    %c0_18 = arith.constant 0 : index
    %c0_19 = arith.constant 0 : index
    %9 = vector.load %arg5[%c0_17, %c0_18, %c0_19] : memref<6x32x32xf32, #tpu.memory_space<vmem>>, vector<1x32x32xf32>
    %10 = vector.shape_cast %9 : vector<1x32x32xf32> to vector<32x32xf32>
    %cst = arith.constant dense<0.000000e+00> : vector<16x32xf32>
    %11 = tpu.matmul %0, %10, %cst {dimension_numbers = #tpu.dot_dimension_numbers<[1], [0], [0], [1], [0, 0, 1, 1], [], []>} : vector<16x32xf32>, vector<32x32xf32>, vector<16x32xf32> -> vector<16x32xf32>
    %12 = vector.extract_strided_slice %2 {offsets = [0, 0], sizes = [1, 32], strides = [1, 1]} : vector<6x32xf32> to vector<1x32xf32>
    %13 = vector.broadcast %12 : vector<1x32xf32> to vector<16x32xf32>
    %14 = arith.addf %11, %13 : vector<16x32xf32>
    %c1 = arith.constant 1 : index
    %c0_20 = arith.constant 0 : index
    %c0_21 = arith.constant 0 : index
    %15 = vector.load %arg5[%c1, %c0_20, %c0_21] : memref<6x32x32xf32, #tpu.memory_space<vmem>>, vector<1x32x32xf32>
    %16 = vector.shape_cast %15 : vector<1x32x32xf32> to vector<32x32xf32>
    %cst_22 = arith.constant dense<0.000000e+00> : vector<16x32xf32>
    %17 = tpu.matmul %0, %16, %cst_22 {dimension_numbers = #tpu.dot_dimension_numbers<[1], [0], [0], [1], [0, 0, 1, 1], [], []>} : vector<16x32xf32>, vector<32x32xf32>, vector<16x32xf32> -> vector<16x32xf32>
    %18 = vector.extract_strided_slice %2 {offsets = [1, 0], sizes = [1, 32], strides = [1, 1]} : vector<6x32xf32> to vector<1x32xf32>
    %19 = vector.broadcast %18 : vector<1x32xf32> to vector<16x32xf32>
    %20 = arith.addf %17, %19 : vector<16x32xf32>
    %c2 = arith.constant 2 : index
    %c0_23 = arith.constant 0 : index
    %c0_24 = arith.constant 0 : index
    %21 = vector.load %arg5[%c2, %c0_23, %c0_24] : memref<6x32x32xf32, #tpu.memory_space<vmem>>, vector<1x32x32xf32>
    %22 = vector.shape_cast %21 : vector<1x32x32xf32> to vector<32x32xf32>
    %cst_25 = arith.constant dense<0.000000e+00> : vector<16x32xf32>
    %23 = tpu.matmul %0, %22, %cst_25 {dimension_numbers = #tpu.dot_dimension_numbers<[1], [0], [0], [1], [0, 0, 1, 1], [], []>} : vector<16x32xf32>, vector<32x32xf32>, vector<16x32xf32> -> vector<16x32xf32>
    %24 = vector.extract_strided_slice %2 {offsets = [2, 0], sizes = [1, 32], strides = [1, 1]} : vector<6x32xf32> to vector<1x32xf32>
    %25 = vector.broadcast %24 : vector<1x32xf32> to vector<16x32xf32>
    %26 = arith.addf %23, %25 : vector<16x32xf32>
    %27 = vector.extract_strided_slice %14 {offsets = [0, 0], sizes = [8, 8], strides = [1, 1]} : vector<16x32xf32> to vector<8x8xf32>
    %28 = vector.extract_strided_slice %14 {offsets = [0, 8], sizes = [8, 8], strides = [1, 1]} : vector<16x32xf32> to vector<8x8xf32>
    %29 = vector.extract_strided_slice %14 {offsets = [0, 16], sizes = [8, 8], strides = [1, 1]} : vector<16x32xf32> to vector<8x8xf32>
    %30 = vector.extract_strided_slice %14 {offsets = [0, 24], sizes = [8, 8], strides = [1, 1]} : vector<16x32xf32> to vector<8x8xf32>
    %31 = vector.extract_strided_slice %14 {offsets = [8, 0], sizes = [8, 8], strides = [1, 1]} : vector<16x32xf32> to vector<8x8xf32>
    %32 = vector.extract_strided_slice %14 {offsets = [8, 8], sizes = [8, 8], strides = [1, 1]} : vector<16x32xf32> to vector<8x8xf32>
    %33 = vector.extract_strided_slice %14 {offsets = [8, 16], sizes = [8, 8], strides = [1, 1]} : vector<16x32xf32> to vector<8x8xf32>
    %34 = vector.extract_strided_slice %14 {offsets = [8, 24], sizes = [8, 8], strides = [1, 1]} : vector<16x32xf32> to vector<8x8xf32>
    %35 = vector.shape_cast %27 : vector<8x8xf32> to vector<1x8x8xf32>
    %36 = vector.shape_cast %28 : vector<8x8xf32> to vector<1x8x8xf32>
    %37 = vector.shape_cast %29 : vector<8x8xf32> to vector<1x8x8xf32>
    %38 = vector.shape_cast %30 : vector<8x8xf32> to vector<1x8x8xf32>
    %39 = vector.shape_cast %31 : vector<8x8xf32> to vector<1x8x8xf32>
    %40 = vector.shape_cast %32 : vector<8x8xf32> to vector<1x8x8xf32>
    %41 = vector.shape_cast %33 : vector<8x8xf32> to vector<1x8x8xf32>
    %42 = vector.shape_cast %34 : vector<8x8xf32> to vector<1x8x8xf32>
    %43 = tpu.concatenate %35, %36, %37, %38, %39, %40, %41, %42 in 0 : vector<1x8x8xf32>, vector<1x8x8xf32>, vector<1x8x8xf32>, vector<1x8x8xf32>, vector<1x8x8xf32>, vector<1x8x8xf32>, vector<1x8x8xf32>, vector<1x8x8xf32> -> vector<8x8x8xf32>
    %44 = vector.extract_strided_slice %20 {offsets = [0, 0], sizes = [8, 8], strides = [1, 1]} : vector<16x32xf32> to vector<8x8xf32>
    %45 = vector.extract_strided_slice %20 {offsets = [0, 8], sizes = [8, 8], strides = [1, 1]} : vector<16x32xf32> to vector<8x8xf32>
    %46 = vector.extract_strided_slice %20 {offsets = [0, 16], sizes = [8, 8], strides = [1, 1]} : vector<16x32xf32> to vector<8x8xf32>
    %47 = vector.extract_strided_slice %20 {offsets = [0, 24], sizes = [8, 8], strides = [1, 1]} : vector<16x32xf32> to vector<8x8xf32>
    %48 = vector.extract_strided_slice %20 {offsets = [8, 0], sizes = [8, 8], strides = [1, 1]} : vector<16x32xf32> to vector<8x8xf32>
    %49 = vector.extract_strided_slice %20 {offsets = [8, 8], sizes = [8, 8], strides = [1, 1]} : vector<16x32xf32> to vector<8x8xf32>
    %50 = vector.extract_strided_slice %20 {offsets = [8, 16], sizes = [8, 8], strides = [1, 1]} : vector<16x32xf32> to vector<8x8xf32>
    %51 = vector.extract_strided_slice %20 {offsets = [8, 24], sizes = [8, 8], strides = [1, 1]} : vector<16x32xf32> to vector<8x8xf32>
    %52 = vector.shape_cast %44 : vector<8x8xf32> to vector<1x8x8xf32>
    %53 = vector.shape_cast %45 : vector<8x8xf32> to vector<1x8x8xf32>
    %54 = vector.shape_cast %46 : vector<8x8xf32> to vector<1x8x8xf32>
    %55 = vector.shape_cast %47 : vector<8x8xf32> to vector<1x8x8xf32>
    %56 = vector.shape_cast %48 : vector<8x8xf32> to vector<1x8x8xf32>
    %57 = vector.shape_cast %49 : vector<8x8xf32> to vector<1x8x8xf32>
    %58 = vector.shape_cast %50 : vector<8x8xf32> to vector<1x8x8xf32>
    %59 = vector.shape_cast %51 : vector<8x8xf32> to vector<1x8x8xf32>
    %60 = tpu.concatenate %52, %53, %54, %55, %56, %57, %58, %59 in 0 : vector<1x8x8xf32>, vector<1x8x8xf32>, vector<1x8x8xf32>, vector<1x8x8xf32>, vector<1x8x8xf32>, vector<1x8x8xf32>, vector<1x8x8xf32>, vector<1x8x8xf32> -> vector<8x8x8xf32>
    %61 = vector.extract_strided_slice %26 {offsets = [0, 0], sizes = [8, 8], strides = [1, 1]} : vector<16x32xf32> to vector<8x8xf32>
    %62 = vector.extract_strided_slice %26 {offsets = [0, 8], sizes = [8, 8], strides = [1, 1]} : vector<16x32xf32> to vector<8x8xf32>
    %63 = vector.extract_strided_slice %26 {offsets = [0, 16], sizes = [8, 8], strides = [1, 1]} : vector<16x32xf32> to vector<8x8xf32>
    %64 = vector.extract_strided_slice %26 {offsets = [0, 24], sizes = [8, 8], strides = [1, 1]} : vector<16x32xf32> to vector<8x8xf32>
    %65 = vector.extract_strided_slice %26 {offsets = [8, 0], sizes = [8, 8], strides = [1, 1]} : vector<16x32xf32> to vector<8x8xf32>
    %66 = vector.extract_strided_slice %26 {offsets = [8, 8], sizes = [8, 8], strides = [1, 1]} : vector<16x32xf32> to vector<8x8xf32>
    %67 = vector.extract_strided_slice %26 {offsets = [8, 16], sizes = [8, 8], strides = [1, 1]} : vector<16x32xf32> to vector<8x8xf32>
    %68 = vector.extract_strided_slice %26 {offsets = [8, 24], sizes = [8, 8], strides = [1, 1]} : vector<16x32xf32> to vector<8x8xf32>
    %69 = vector.shape_cast %61 : vector<8x8xf32> to vector<1x8x8xf32>
    %70 = vector.shape_cast %62 : vector<8x8xf32> to vector<1x8x8xf32>
    %71 = vector.shape_cast %63 : vector<8x8xf32> to vector<1x8x8xf32>
    %72 = vector.shape_cast %64 : vector<8x8xf32> to vector<1x8x8xf32>
    %73 = vector.shape_cast %65 : vector<8x8xf32> to vector<1x8x8xf32>
    %74 = vector.shape_cast %66 : vector<8x8xf32> to vector<1x8x8xf32>
    %75 = vector.shape_cast %67 : vector<8x8xf32> to vector<1x8x8xf32>
    %76 = vector.shape_cast %68 : vector<8x8xf32> to vector<1x8x8xf32>
    %77 = tpu.concatenate %69, %70, %71, %72, %73, %74, %75, %76 in 0 : vector<1x8x8xf32>, vector<1x8x8xf32>, vector<1x8x8xf32>, vector<1x8x8xf32>, vector<1x8x8xf32>, vector<1x8x8xf32>, vector<1x8x8xf32>, vector<1x8x8xf32> -> vector<8x8x8xf32>
    "tpu.trace_start"() <{level = 10 : i32, message = "bqd,bkd->bqk"}> : () -> ()
    %cst_26 = arith.constant dense<0.000000e+00> : vector<8x8x8xf32>
    %78 = tpu.matmul %43, %60, %cst_26 {dimension_numbers = #tpu.dot_dimension_numbers<[2], [2], [1], [1], [0, 0, 0, 1, 1, 1], [0], [0]>} : vector<8x8x8xf32>, vector<8x8x8xf32>, vector<8x8x8xf32> -> vector<8x8x8xf32>
    "tpu.trace_stop"() : () -> ()
    %79 = arith.addf %78, %6 : vector<8x8x8xf32>
    %cst_27 = arith.constant dense<0xFF800000> : vector<8x8xf32>
    %80 = vector.multi_reduction <maximumf>, %79, %cst_27 [2] : vector<8x8x8xf32> to vector<8x8xf32>
    %81 = vector.shape_cast %80 : vector<8x8xf32> to vector<8x8x1xf32>
    %82 = vector.broadcast %81 : vector<8x8x1xf32> to vector<8x8x8xf32>
    %83 = arith.subf %79, %82 : vector<8x8x8xf32>
    %84 = math.exp %83 : vector<8x8x8xf32>
    %cst_28 = arith.constant dense<0.000000e+00> : vector<8x8xf32>
    %85 = vector.multi_reduction <add>, %84, %cst_28 [2] : vector<8x8x8xf32> to vector<8x8xf32>
    %86 = vector.shape_cast %85 : vector<8x8xf32> to vector<8x8x1xf32>
    %87 = tpu.reciprocal %86 {approx = true} : vector<8x8x1xf32> -> vector<8x8x1xf32>
    %88 = vector.broadcast %87 : vector<8x8x1xf32> to vector<8x8x8xf32>
    %89 = arith.mulf %84, %88 : vector<8x8x8xf32>
    "tpu.trace_start"() <{level = 10 : i32, message = "bqk,bkd->bqd"}> : () -> ()
    %cst_29 = arith.constant dense<0.000000e+00> : vector<8x8x8xf32>
    %90 = tpu.matmul %89, %77, %cst_29 {dimension_numbers = #tpu.dot_dimension_numbers<[2], [1], [1], [2], [0, 0, 0, 1, 1, 2], [0], [0]>} : vector<8x8x8xf32>, vector<8x8x8xf32>, vector<8x8x8xf32> -> vector<8x8x8xf32>
    "tpu.trace_stop"() : () -> ()
    "tpu.trace_start"() <{level = 10 : i32, message = "bqd,bdo->bqo"}> : () -> ()
    %cst_30 = arith.constant dense<0.000000e+00> : vector<8x8x32xf32>
    %91 = tpu.matmul %90, %7, %cst_30 {dimension_numbers = #tpu.dot_dimension_numbers<[2], [1], [1], [2], [0, 0, 0, 1, 1, 2], [0], [0]>} : vector<8x8x8xf32>, vector<8x8x32xf32>, vector<8x8x32xf32> -> vector<8x8x32xf32>
    "tpu.trace_stop"() : () -> ()
    %92 = vector.shape_cast %91 : vector<8x8x32xf32> to vector<2x4x8x32xf32>
    %93 = vector.extract_strided_slice %92 {offsets = [0, 0, 0, 0], sizes = [2, 1, 8, 32], strides = [1, 1, 1, 1]} : vector<2x4x8x32xf32> to vector<2x1x8x32xf32>
    %94 = vector.shape_cast %93 : vector<2x1x8x32xf32> to vector<2x8x32xf32>
    %95 = vector.extract_strided_slice %92 {offsets = [0, 1, 0, 0], sizes = [2, 1, 8, 32], strides = [1, 1, 1, 1]} : vector<2x4x8x32xf32> to vector<2x1x8x32xf32>
    %96 = vector.shape_cast %95 : vector<2x1x8x32xf32> to vector<2x8x32xf32>
    %97 = arith.addf %94, %96 : vector<2x8x32xf32>
    %98 = vector.extract_strided_slice %92 {offsets = [0, 2, 0, 0], sizes = [2, 1, 8, 32], strides = [1, 1, 1, 1]} : vector<2x4x8x32xf32> to vector<2x1x8x32xf32>
    %99 = vector.shape_cast %98 : vector<2x1x8x32xf32> to vector<2x8x32xf32>
    %100 = arith.addf %97, %99 : vector<2x8x32xf32>
    %101 = vector.extract_strided_slice %92 {offsets = [0, 3, 0, 0], sizes = [2, 1, 8, 32], strides = [1, 1, 1, 1]} : vector<2x4x8x32xf32> to vector<2x1x8x32xf32>
    %102 = vector.shape_cast %101 : vector<2x1x8x32xf32> to vector<2x8x32xf32>
    %103 = arith.addf %100, %102 : vector<2x8x32xf32>
    %104 = vector.shape_cast %103 : vector<2x8x32xf32> to vector<16x32xf32>
    %105 = vector.broadcast %8 : vector<1x32xf32> to vector<16x32xf32>
    %106 = arith.addf %104, %105 : vector<16x32xf32>
    %107 = arith.addf %0, %106 : vector<16x32xf32>
    %cst_31 = arith.constant dense<0.000000e+00> : vector<16xf32>
    %108 = vector.multi_reduction <add>, %107, %cst_31 [1] : vector<16x32xf32> to vector<16xf32>
    %109 = vector.shape_cast %108 : vector<16xf32> to vector<16x1xf32>
    %cst_32 = arith.constant 3.200000e+01 : f32
    %110 = vector.broadcast %cst_32 : f32 to vector<16x1xf32>
    %111 = arith.divf %109, %110 : vector<16x1xf32>
    %112 = vector.broadcast %111 : vector<16x1xf32> to vector<16x32xf32>
    %113 = arith.subf %107, %112 : vector<16x32xf32>
    %114 = arith.mulf %113, %113 : vector<16x32xf32>
    %cst_33 = arith.constant dense<0.000000e+00> : vector<16xf32>
    %115 = vector.multi_reduction <add>, %114, %cst_33 [1] : vector<16x32xf32> to vector<16xf32>
    %116 = vector.shape_cast %115 : vector<16xf32> to vector<16x1xf32>
    %cst_34 = arith.constant 3.200000e+01 : f32
    %117 = vector.broadcast %cst_34 : f32 to vector<16x1xf32>
    %118 = arith.divf %116, %117 : vector<16x1xf32>
    %cst_35 = arith.constant 9.99999974E-6 : f32
    %119 = vector.broadcast %cst_35 : f32 to vector<16x1xf32>
    %120 = arith.addf %118, %119 : vector<16x1xf32>
    %121 = math.rsqrt %120 : vector<16x1xf32>
    %122 = vector.broadcast %121 : vector<16x1xf32> to vector<16x32xf32>
    %123 = arith.mulf %113, %122 : vector<16x32xf32>
    %124 = vector.extract_strided_slice %4 {offsets = [0, 0], sizes = [1, 32], strides = [1, 1]} : vector<3x32xf32> to vector<1x32xf32>
    %125 = vector.broadcast %124 : vector<1x32xf32> to vector<16x32xf32>
    %126 = arith.mulf %123, %125 : vector<16x32xf32>
    %127 = vector.extract_strided_slice %5 {offsets = [0, 0], sizes = [1, 32], strides = [1, 1]} : vector<3x32xf32> to vector<1x32xf32>
    %128 = vector.broadcast %127 : vector<1x32xf32> to vector<16x32xf32>
    %129 = arith.addf %126, %128 : vector<16x32xf32>
    %c0_36 = arith.constant 0 : index
    %c0_37 = arith.constant 0 : index
    %c0_38 = arith.constant 0 : index
    %130 = vector.load %arg4[%c0_36, %c0_37, %c0_38] : memref<8x8x8xf32, #tpu.memory_space<vmem>>, vector<8x8x8xf32>
    %c0_39 = arith.constant 0 : index
    %c0_40 = arith.constant 0 : index
    %c0_41 = arith.constant 0 : index
    %131 = vector.load %arg8[%c0_39, %c0_40, %c0_41] : memref<8x8x32xf32, #tpu.memory_space<vmem>>, vector<8x8x32xf32>
    %132 = vector.extract_strided_slice %3 {offsets = [1, 0], sizes = [1, 32], strides = [1, 1]} : vector<2x32xf32> to vector<1x32xf32>
    %c3 = arith.constant 3 : index
    %c0_42 = arith.constant 0 : index
    %c0_43 = arith.constant 0 : index
    %133 = vector.load %arg5[%c3, %c0_42, %c0_43] : memref<6x32x32xf32, #tpu.memory_space<vmem>>, vector<1x32x32xf32>
    %134 = vector.shape_cast %133 : vector<1x32x32xf32> to vector<32x32xf32>
    %cst_44 = arith.constant dense<0.000000e+00> : vector<16x32xf32>
    %135 = tpu.matmul %129, %134, %cst_44 {dimension_numbers = #tpu.dot_dimension_numbers<[1], [0], [0], [1], [0, 0, 1, 1], [], []>} : vector<16x32xf32>, vector<32x32xf32>, vector<16x32xf32> -> vector<16x32xf32>
    %136 = vector.extract_strided_slice %2 {offsets = [3, 0], sizes = [1, 32], strides = [1, 1]} : vector<6x32xf32> to vector<1x32xf32>
    %137 = vector.broadcast %136 : vector<1x32xf32> to vector<16x32xf32>
    %138 = arith.addf %135, %137 : vector<16x32xf32>
    %c4 = arith.constant 4 : index
    %c0_45 = arith.constant 0 : index
    %c0_46 = arith.constant 0 : index
    %139 = vector.load %arg5[%c4, %c0_45, %c0_46] : memref<6x32x32xf32, #tpu.memory_space<vmem>>, vector<1x32x32xf32>
    %140 = vector.shape_cast %139 : vector<1x32x32xf32> to vector<32x32xf32>
    %cst_47 = arith.constant dense<0.000000e+00> : vector<16x32xf32>
    %141 = tpu.matmul %1, %140, %cst_47 {dimension_numbers = #tpu.dot_dimension_numbers<[1], [0], [0], [1], [0, 0, 1, 1], [], []>} : vector<16x32xf32>, vector<32x32xf32>, vector<16x32xf32> -> vector<16x32xf32>
    %142 = vector.extract_strided_slice %2 {offsets = [4, 0], sizes = [1, 32], strides = [1, 1]} : vector<6x32xf32> to vector<1x32xf32>
    %143 = vector.broadcast %142 : vector<1x32xf32> to vector<16x32xf32>
    %144 = arith.addf %141, %143 : vector<16x32xf32>
    %c5 = arith.constant 5 : index
    %c0_48 = arith.constant 0 : index
    %c0_49 = arith.constant 0 : index
    %145 = vector.load %arg5[%c5, %c0_48, %c0_49] : memref<6x32x32xf32, #tpu.memory_space<vmem>>, vector<1x32x32xf32>
    %146 = vector.shape_cast %145 : vector<1x32x32xf32> to vector<32x32xf32>
    %cst_50 = arith.constant dense<0.000000e+00> : vector<16x32xf32>
    %147 = tpu.matmul %1, %146, %cst_50 {dimension_numbers = #tpu.dot_dimension_numbers<[1], [0], [0], [1], [0, 0, 1, 1], [], []>} : vector<16x32xf32>, vector<32x32xf32>, vector<16x32xf32> -> vector<16x32xf32>
    %148 = vector.extract_strided_slice %2 {offsets = [5, 0], sizes = [1, 32], strides = [1, 1]} : vector<6x32xf32> to vector<1x32xf32>
    %149 = vector.broadcast %148 : vector<1x32xf32> to vector<16x32xf32>
    %150 = arith.addf %147, %149 : vector<16x32xf32>
    %151 = vector.extract_strided_slice %138 {offsets = [0, 0], sizes = [8, 8], strides = [1, 1]} : vector<16x32xf32> to vector<8x8xf32>
    %152 = vector.extract_strided_slice %138 {offsets = [0, 8], sizes = [8, 8], strides = [1, 1]} : vector<16x32xf32> to vector<8x8xf32>
    %153 = vector.extract_strided_slice %138 {offsets = [0, 16], sizes = [8, 8], strides = [1, 1]} : vector<16x32xf32> to vector<8x8xf32>
    %154 = vector.extract_strided_slice %138 {offsets = [0, 24], sizes = [8, 8], strides = [1, 1]} : vector<16x32xf32> to vector<8x8xf32>
    %155 = vector.extract_strided_slice %138 {offsets = [8, 0], sizes = [8, 8], strides = [1, 1]} : vector<16x32xf32> to vector<8x8xf32>
    %156 = vector.extract_strided_slice %138 {offsets = [8, 8], sizes = [8, 8], strides = [1, 1]} : vector<16x32xf32> to vector<8x8xf32>
    %157 = vector.extract_strided_slice %138 {offsets = [8, 16], sizes = [8, 8], strides = [1, 1]} : vector<16x32xf32> to vector<8x8xf32>
    %158 = vector.extract_strided_slice %138 {offsets = [8, 24], sizes = [8, 8], strides = [1, 1]} : vector<16x32xf32> to vector<8x8xf32>
    %159 = vector.shape_cast %151 : vector<8x8xf32> to vector<1x8x8xf32>
    %160 = vector.shape_cast %152 : vector<8x8xf32> to vector<1x8x8xf32>
    %161 = vector.shape_cast %153 : vector<8x8xf32> to vector<1x8x8xf32>
    %162 = vector.shape_cast %154 : vector<8x8xf32> to vector<1x8x8xf32>
    %163 = vector.shape_cast %155 : vector<8x8xf32> to vector<1x8x8xf32>
    %164 = vector.shape_cast %156 : vector<8x8xf32> to vector<1x8x8xf32>
    %165 = vector.shape_cast %157 : vector<8x8xf32> to vector<1x8x8xf32>
    %166 = vector.shape_cast %158 : vector<8x8xf32> to vector<1x8x8xf32>
    %167 = tpu.concatenate %159, %160, %161, %162, %163, %164, %165, %166 in 0 : vector<1x8x8xf32>, vector<1x8x8xf32>, vector<1x8x8xf32>, vector<1x8x8xf32>, vector<1x8x8xf32>, vector<1x8x8xf32>, vector<1x8x8xf32>, vector<1x8x8xf32> -> vector<8x8x8xf32>
    %168 = vector.extract_strided_slice %144 {offsets = [0, 0], sizes = [8, 8], strides = [1, 1]} : vector<16x32xf32> to vector<8x8xf32>
    %169 = vector.extract_strided_slice %144 {offsets = [0, 8], sizes = [8, 8], strides = [1, 1]} : vector<16x32xf32> to vector<8x8xf32>
    %170 = vector.extract_strided_slice %144 {offsets = [0, 16], sizes = [8, 8], strides = [1, 1]} : vector<16x32xf32> to vector<8x8xf32>
    %171 = vector.extract_strided_slice %144 {offsets = [0, 24], sizes = [8, 8], strides = [1, 1]} : vector<16x32xf32> to vector<8x8xf32>
    %172 = vector.extract_strided_slice %144 {offsets = [8, 0], sizes = [8, 8], strides = [1, 1]} : vector<16x32xf32> to vector<8x8xf32>
    %173 = vector.extract_strided_slice %144 {offsets = [8, 8], sizes = [8, 8], strides = [1, 1]} : vector<16x32xf32> to vector<8x8xf32>
    %174 = vector.extract_strided_slice %144 {offsets = [8, 16], sizes = [8, 8], strides = [1, 1]} : vector<16x32xf32> to vector<8x8xf32>
    %175 = vector.extract_strided_slice %144 {offsets = [8, 24], sizes = [8, 8], strides = [1, 1]} : vector<16x32xf32> to vector<8x8xf32>
    %176 = vector.shape_cast %168 : vector<8x8xf32> to vector<1x8x8xf32>
    %177 = vector.shape_cast %169 : vector<8x8xf32> to vector<1x8x8xf32>
    %178 = vector.shape_cast %170 : vector<8x8xf32> to vector<1x8x8xf32>
    %179 = vector.shape_cast %171 : vector<8x8xf32> to vector<1x8x8xf32>
    %180 = vector.shape_cast %172 : vector<8x8xf32> to vector<1x8x8xf32>
    %181 = vector.shape_cast %173 : vector<8x8xf32> to vector<1x8x8xf32>
    %182 = vector.shape_cast %174 : vector<8x8xf32> to vector<1x8x8xf32>
    %183 = vector.shape_cast %175 : vector<8x8xf32> to vector<1x8x8xf32>
    %184 = tpu.concatenate %176, %177, %178, %179, %180, %181, %182, %183 in 0 : vector<1x8x8xf32>, vector<1x8x8xf32>, vector<1x8x8xf32>, vector<1x8x8xf32>, vector<1x8x8xf32>, vector<1x8x8xf32>, vector<1x8x8xf32>, vector<1x8x8xf32> -> vector<8x8x8xf32>
    %185 = vector.extract_strided_slice %150 {offsets = [0, 0], sizes = [8, 8], strides = [1, 1]} : vector<16x32xf32> to vector<8x8xf32>
    %186 = vector.extract_strided_slice %150 {offsets = [0, 8], sizes = [8, 8], strides = [1, 1]} : vector<16x32xf32> to vector<8x8xf32>
    %187 = vector.extract_strided_slice %150 {offsets = [0, 16], sizes = [8, 8], strides = [1, 1]} : vector<16x32xf32> to vector<8x8xf32>
    %188 = vector.extract_strided_slice %150 {offsets = [0, 24], sizes = [8, 8], strides = [1, 1]} : vector<16x32xf32> to vector<8x8xf32>
    %189 = vector.extract_strided_slice %150 {offsets = [8, 0], sizes = [8, 8], strides = [1, 1]} : vector<16x32xf32> to vector<8x8xf32>
    %190 = vector.extract_strided_slice %150 {offsets = [8, 8], sizes = [8, 8], strides = [1, 1]} : vector<16x32xf32> to vector<8x8xf32>
    %191 = vector.extract_strided_slice %150 {offsets = [8, 16], sizes = [8, 8], strides = [1, 1]} : vector<16x32xf32> to vector<8x8xf32>
    %192 = vector.extract_strided_slice %150 {offsets = [8, 24], sizes = [8, 8], strides = [1, 1]} : vector<16x32xf32> to vector<8x8xf32>
    %193 = vector.shape_cast %185 : vector<8x8xf32> to vector<1x8x8xf32>
    %194 = vector.shape_cast %186 : vector<8x8xf32> to vector<1x8x8xf32>
    %195 = vector.shape_cast %187 : vector<8x8xf32> to vector<1x8x8xf32>
    %196 = vector.shape_cast %188 : vector<8x8xf32> to vector<1x8x8xf32>
    %197 = vector.shape_cast %189 : vector<8x8xf32> to vector<1x8x8xf32>
    %198 = vector.shape_cast %190 : vector<8x8xf32> to vector<1x8x8xf32>
    %199 = vector.shape_cast %191 : vector<8x8xf32> to vector<1x8x8xf32>
    %200 = vector.shape_cast %192 : vector<8x8xf32> to vector<1x8x8xf32>
    %201 = tpu.concatenate %193, %194, %195, %196, %197, %198, %199, %200 in 0 : vector<1x8x8xf32>, vector<1x8x8xf32>, vector<1x8x8xf32>, vector<1x8x8xf32>, vector<1x8x8xf32>, vector<1x8x8xf32>, vector<1x8x8xf32>, vector<1x8x8xf32> -> vector<8x8x8xf32>
    "tpu.trace_start"() <{level = 10 : i32, message = "bqd,bkd->bqk"}> : () -> ()
    %cst_51 = arith.constant dense<0.000000e+00> : vector<8x8x8xf32>
    %202 = tpu.matmul %167, %184, %cst_51 {dimension_numbers = #tpu.dot_dimension_numbers<[2], [2], [1], [1], [0, 0, 0, 1, 1, 1], [0], [0]>} : vector<8x8x8xf32>, vector<8x8x8xf32>, vector<8x8x8xf32> -> vector<8x8x8xf32>
    "tpu.trace_stop"() : () -> ()
    %203 = arith.addf %202, %130 : vector<8x8x8xf32>
    %cst_52 = arith.constant dense<0xFF800000> : vector<8x8xf32>
    %204 = vector.multi_reduction <maximumf>, %203, %cst_52 [2] : vector<8x8x8xf32> to vector<8x8xf32>
    %205 = vector.shape_cast %204 : vector<8x8xf32> to vector<8x8x1xf32>
    %206 = vector.broadcast %205 : vector<8x8x1xf32> to vector<8x8x8xf32>
    %207 = arith.subf %203, %206 : vector<8x8x8xf32>
    %208 = math.exp %207 : vector<8x8x8xf32>
    %cst_53 = arith.constant dense<0.000000e+00> : vector<8x8xf32>
    %209 = vector.multi_reduction <add>, %208, %cst_53 [2] : vector<8x8x8xf32> to vector<8x8xf32>
    %210 = vector.shape_cast %209 : vector<8x8xf32> to vector<8x8x1xf32>
    %211 = tpu.reciprocal %210 {approx = true} : vector<8x8x1xf32> -> vector<8x8x1xf32>
    %212 = vector.broadcast %211 : vector<8x8x1xf32> to vector<8x8x8xf32>
    %213 = arith.mulf %208, %212 : vector<8x8x8xf32>
    "tpu.trace_start"() <{level = 10 : i32, message = "bqk,bkd->bqd"}> : () -> ()
    %cst_54 = arith.constant dense<0.000000e+00> : vector<8x8x8xf32>
    %214 = tpu.matmul %213, %201, %cst_54 {dimension_numbers = #tpu.dot_dimension_numbers<[2], [1], [1], [2], [0, 0, 0, 1, 1, 2], [0], [0]>} : vector<8x8x8xf32>, vector<8x8x8xf32>, vector<8x8x8xf32> -> vector<8x8x8xf32>
    "tpu.trace_stop"() : () -> ()
    "tpu.trace_start"() <{level = 10 : i32, message = "bqd,bdo->bqo"}> : () -> ()
    %cst_55 = arith.constant dense<0.000000e+00> : vector<8x8x32xf32>
    %215 = tpu.matmul %214, %131, %cst_55 {dimension_numbers = #tpu.dot_dimension_numbers<[2], [1], [1], [2], [0, 0, 0, 1, 1, 2], [0], [0]>} : vector<8x8x8xf32>, vector<8x8x32xf32>, vector<8x8x32xf32> -> vector<8x8x32xf32>
    "tpu.trace_stop"() : () -> ()
    %216 = vector.shape_cast %215 : vector<8x8x32xf32> to vector<2x4x8x32xf32>
    %217 = vector.extract_strided_slice %216 {offsets = [0, 0, 0, 0], sizes = [2, 1, 8, 32], strides = [1, 1, 1, 1]} : vector<2x4x8x32xf32> to vector<2x1x8x32xf32>
    %218 = vector.shape_cast %217 : vector<2x1x8x32xf32> to vector<2x8x32xf32>
    %219 = vector.extract_strided_slice %216 {offsets = [0, 1, 0, 0], sizes = [2, 1, 8, 32], strides = [1, 1, 1, 1]} : vector<2x4x8x32xf32> to vector<2x1x8x32xf32>
    %220 = vector.shape_cast %219 : vector<2x1x8x32xf32> to vector<2x8x32xf32>
    %221 = arith.addf %218, %220 : vector<2x8x32xf32>
    %222 = vector.extract_strided_slice %216 {offsets = [0, 2, 0, 0], sizes = [2, 1, 8, 32], strides = [1, 1, 1, 1]} : vector<2x4x8x32xf32> to vector<2x1x8x32xf32>
    %223 = vector.shape_cast %222 : vector<2x1x8x32xf32> to vector<2x8x32xf32>
    %224 = arith.addf %221, %223 : vector<2x8x32xf32>
    %225 = vector.extract_strided_slice %216 {offsets = [0, 3, 0, 0], sizes = [2, 1, 8, 32], strides = [1, 1, 1, 1]} : vector<2x4x8x32xf32> to vector<2x1x8x32xf32>
    %226 = vector.shape_cast %225 : vector<2x1x8x32xf32> to vector<2x8x32xf32>
    %227 = arith.addf %224, %226 : vector<2x8x32xf32>
    %228 = vector.shape_cast %227 : vector<2x8x32xf32> to vector<16x32xf32>
    %229 = vector.broadcast %132 : vector<1x32xf32> to vector<16x32xf32>
    %230 = arith.addf %228, %229 : vector<16x32xf32>
    %231 = arith.addf %129, %230 : vector<16x32xf32>
    %cst_56 = arith.constant dense<0.000000e+00> : vector<16xf32>
    %232 = vector.multi_reduction <add>, %231, %cst_56 [1] : vector<16x32xf32> to vector<16xf32>
    %233 = vector.shape_cast %232 : vector<16xf32> to vector<16x1xf32>
    %cst_57 = arith.constant 3.200000e+01 : f32
    %234 = vector.broadcast %cst_57 : f32 to vector<16x1xf32>
    %235 = arith.divf %233, %234 : vector<16x1xf32>
    %236 = vector.broadcast %235 : vector<16x1xf32> to vector<16x32xf32>
    %237 = arith.subf %231, %236 : vector<16x32xf32>
    %238 = arith.mulf %237, %237 : vector<16x32xf32>
    %cst_58 = arith.constant dense<0.000000e+00> : vector<16xf32>
    %239 = vector.multi_reduction <add>, %238, %cst_58 [1] : vector<16x32xf32> to vector<16xf32>
    %240 = vector.shape_cast %239 : vector<16xf32> to vector<16x1xf32>
    %cst_59 = arith.constant 3.200000e+01 : f32
    %241 = vector.broadcast %cst_59 : f32 to vector<16x1xf32>
    %242 = arith.divf %240, %241 : vector<16x1xf32>
    %cst_60 = arith.constant 9.99999974E-6 : f32
    %243 = vector.broadcast %cst_60 : f32 to vector<16x1xf32>
    %244 = arith.addf %242, %243 : vector<16x1xf32>
    %245 = math.rsqrt %244 : vector<16x1xf32>
    %246 = vector.broadcast %245 : vector<16x1xf32> to vector<16x32xf32>
    %247 = arith.mulf %237, %246 : vector<16x32xf32>
    %248 = vector.extract_strided_slice %4 {offsets = [1, 0], sizes = [1, 32], strides = [1, 1]} : vector<3x32xf32> to vector<1x32xf32>
    %249 = vector.broadcast %248 : vector<1x32xf32> to vector<16x32xf32>
    %250 = arith.mulf %247, %249 : vector<16x32xf32>
    %251 = vector.extract_strided_slice %5 {offsets = [1, 0], sizes = [1, 32], strides = [1, 1]} : vector<3x32xf32> to vector<1x32xf32>
    %252 = vector.broadcast %251 : vector<1x32xf32> to vector<16x32xf32>
    %253 = arith.addf %250, %252 : vector<16x32xf32>
    %c0_61 = arith.constant 0 : index
    %c0_62 = arith.constant 0 : index
    %254 = vector.load %arg10[%c0_61, %c0_62] : memref<32x64xf32, #tpu.memory_space<vmem>>, vector<32x64xf32>
    %cst_63 = arith.constant dense<0.000000e+00> : vector<16x64xf32>
    %255 = tpu.matmul %253, %254, %cst_63 {dimension_numbers = #tpu.dot_dimension_numbers<[1], [0], [0], [1], [0, 0, 1, 1], [], []>} : vector<16x32xf32>, vector<32x64xf32>, vector<16x64xf32> -> vector<16x64xf32>
    %c0_64 = arith.constant 0 : index
    %c0_65 = arith.constant 0 : index
    %256 = vector.load %arg11[%c0_64, %c0_65] : memref<1x64xf32, #tpu.memory_space<vmem>>, vector<1x64xf32>
    %257 = vector.broadcast %256 : vector<1x64xf32> to vector<16x64xf32>
    %258 = arith.addf %255, %257 : vector<16x64xf32>
    %cst_66 = arith.constant 0.000000e+00 : f32
    %259 = vector.broadcast %cst_66 : f32 to vector<16x64xf32>
    %260 = arith.maximumf %258, %259 : vector<16x64xf32>
    %c0_67 = arith.constant 0 : index
    %c0_68 = arith.constant 0 : index
    %261 = vector.load %arg12[%c0_67, %c0_68] : memref<64x32xf32, #tpu.memory_space<vmem>>, vector<64x32xf32>
    %cst_69 = arith.constant dense<0.000000e+00> : vector<16x32xf32>
    %262 = tpu.matmul %260, %261, %cst_69 {dimension_numbers = #tpu.dot_dimension_numbers<[1], [0], [0], [1], [0, 0, 1, 1], [], []>} : vector<16x64xf32>, vector<64x32xf32>, vector<16x32xf32> -> vector<16x32xf32>
    %c0_70 = arith.constant 0 : index
    %c0_71 = arith.constant 0 : index
    %263 = vector.load %arg13[%c0_70, %c0_71] : memref<1x32xf32, #tpu.memory_space<vmem>>, vector<1x32xf32>
    %264 = vector.broadcast %263 : vector<1x32xf32> to vector<16x32xf32>
    %265 = arith.addf %262, %264 : vector<16x32xf32>
    %266 = arith.addf %253, %265 : vector<16x32xf32>
    %cst_72 = arith.constant dense<0.000000e+00> : vector<16xf32>
    %267 = vector.multi_reduction <add>, %266, %cst_72 [1] : vector<16x32xf32> to vector<16xf32>
    %268 = vector.shape_cast %267 : vector<16xf32> to vector<16x1xf32>
    %cst_73 = arith.constant 3.200000e+01 : f32
    %269 = vector.broadcast %cst_73 : f32 to vector<16x1xf32>
    %270 = arith.divf %268, %269 : vector<16x1xf32>
    %271 = vector.broadcast %270 : vector<16x1xf32> to vector<16x32xf32>
    %272 = arith.subf %266, %271 : vector<16x32xf32>
    %273 = arith.mulf %272, %272 : vector<16x32xf32>
    %cst_74 = arith.constant dense<0.000000e+00> : vector<16xf32>
    %274 = vector.multi_reduction <add>, %273, %cst_74 [1] : vector<16x32xf32> to vector<16xf32>
    %275 = vector.shape_cast %274 : vector<16xf32> to vector<16x1xf32>
    %cst_75 = arith.constant 3.200000e+01 : f32
    %276 = vector.broadcast %cst_75 : f32 to vector<16x1xf32>
    %277 = arith.divf %275, %276 : vector<16x1xf32>
    %cst_76 = arith.constant 9.99999974E-6 : f32
    %278 = vector.broadcast %cst_76 : f32 to vector<16x1xf32>
    %279 = arith.addf %277, %278 : vector<16x1xf32>
    %280 = math.rsqrt %279 : vector<16x1xf32>
    %281 = vector.broadcast %280 : vector<16x1xf32> to vector<16x32xf32>
    %282 = arith.mulf %272, %281 : vector<16x32xf32>
    %283 = vector.extract_strided_slice %4 {offsets = [2, 0], sizes = [1, 32], strides = [1, 1]} : vector<3x32xf32> to vector<1x32xf32>
    %284 = vector.broadcast %283 : vector<1x32xf32> to vector<16x32xf32>
    %285 = arith.mulf %282, %284 : vector<16x32xf32>
    %286 = vector.extract_strided_slice %5 {offsets = [2, 0], sizes = [1, 32], strides = [1, 1]} : vector<3x32xf32> to vector<1x32xf32>
    %287 = vector.broadcast %286 : vector<1x32xf32> to vector<16x32xf32>
    %288 = arith.addf %285, %287 : vector<16x32xf32>
    %c0_77 = arith.constant 0 : index
    %c0_78 = arith.constant 0 : index
    %289 = vector.load %arg16[%c0_77, %c0_78] : memref<16x32xf32, #tpu.memory_space<vmem>>, vector<16x32xf32>
    tpu.vector_store %arg16[%c0_77, %c0_78], %288 {strides = array<i32>} : memref<16x32xf32, #tpu.memory_space<vmem>>, vector<16x32xf32>,
    return
  }
  func.func @transform_0(%arg0: i32) -> (i32, i32) {
    %c0_i32 = arith.constant 0 : i32
    %c0_i32_0 = arith.constant 0 : i32
    %c0_i32_1 = arith.constant 0 : i32
    return %c0_i32, %c0_i32_0 : i32, i32
  }
  func.func @transform_1(%arg0: i32) -> (i32, i32) {
    %c0_i32 = arith.constant 0 : i32
    %c0_i32_0 = arith.constant 0 : i32
    %c0_i32_1 = arith.constant 0 : i32
    return %c0_i32, %c0_i32_0 : i32, i32
  }
  func.func @transform_2(%arg0: i32) -> (i32, i32, i32) {
    %c0_i32 = arith.constant 0 : i32
    %c0_i32_0 = arith.constant 0 : i32
    %c0_i32_1 = arith.constant 0 : i32
    %c0_i32_2 = arith.constant 0 : i32
    return %c0_i32, %c0_i32_0, %c0_i32_1 : i32, i32, i32
  }
  func.func @transform_3(%arg0: i32) -> (i32, i32, i32) {
    %c0_i32 = arith.constant 0 : i32
    %c0_i32_0 = arith.constant 0 : i32
    %c0_i32_1 = arith.constant 0 : i32
    %c0_i32_2 = arith.constant 0 : i32
    return %c0_i32, %c0_i32_0, %c0_i32_1 : i32, i32, i32
  }
  func.func @transform_4(%arg0: i32) -> (i32, i32, i32) {
    %c0_i32 = arith.constant 0 : i32
    %c0_i32_0 = arith.constant 0 : i32
    %c0_i32_1 = arith.constant 0 : i32
    %c0_i32_2 = arith.constant 0 : i32
    return %c0_i32, %c0_i32_0, %c0_i32_1 : i32, i32, i32
  }
  func.func @transform_5(%arg0: i32) -> (i32, i32) {
    %c0_i32 = arith.constant 0 : i32
    %c0_i32_0 = arith.constant 0 : i32
    %c0_i32_1 = arith.constant 0 : i32
    return %c0_i32, %c0_i32_0 : i32, i32
  }
  func.func @transform_6(%arg0: i32) -> (i32, i32, i32) {
    %c0_i32 = arith.constant 0 : i32
    %c0_i32_0 = arith.constant 0 : i32
    %c0_i32_1 = arith.constant 0 : i32
    %c0_i32_2 = arith.constant 0 : i32
    return %c0_i32, %c0_i32_0, %c0_i32_1 : i32, i32, i32
  }
  func.func @transform_7(%arg0: i32) -> (i32, i32, i32) {
    %c0_i32 = arith.constant 0 : i32
    %c0_i32_0 = arith.constant 0 : i32
    %c0_i32_1 = arith.constant 0 : i32
    %c0_i32_2 = arith.constant 0 : i32
    return %c0_i32, %c0_i32_0, %c0_i32_1 : i32, i32, i32
  }
  func.func @transform_8(%arg0: i32) -> (i32, i32) {
    %c0_i32 = arith.constant 0 : i32
    %c0_i32_0 = arith.constant 0 : i32
    %c0_i32_1 = arith.constant 0 : i32
    return %c0_i32, %c0_i32_0 : i32, i32
  }
  func.func @transform_9(%arg0: i32) -> (i32, i32) {
    %c0_i32 = arith.constant 0 : i32
    %c0_i32_0 = arith.constant 0 : i32
    %c0_i32_1 = arith.constant 0 : i32
    return %c0_i32, %c0_i32_0 : i32, i32
  }
  func.func @transform_10(%arg0: i32) -> (i32, i32) {
    %c0_i32 = arith.constant 0 : i32
    %c0_i32_0 = arith.constant 0 : i32
    %c0_i32_1 = arith.constant 0 : i32
    return %c0_i32, %c0_i32_0 : i32, i32
  }
  func.func @transform_11(%arg0: i32) -> (i32, i32) {
    %c0_i32 = arith.constant 0 : i32
    %c0_i32_0 = arith.constant 0 : i32
    %c0_i32_1 = arith.constant 0 : i32
    return %c0_i32, %c0_i32_0 : i32, i32
  }
  func.func @transform_12(%arg0: i32) -> (i32, i32) {
    %c0_i32 = arith.constant 0 : i32
    %c0_i32_0 = arith.constant 0 : i32
    %c0_i32_1 = arith.constant 0 : i32
    return %c0_i32, %c0_i32_0 : i32, i32
  }
  func.func @transform_13(%arg0: i32) -> (i32, i32) {
    %c0_i32 = arith.constant 0 : i32
    %c0_i32_0 = arith.constant 0 : i32
    %c0_i32_1 = arith.constant 0 : i32
    return %c0_i32, %c0_i32_0 : i32, i32
  }
  func.func @transform_14(%arg0: i32) -> (i32, i32) {
    %c0_i32 = arith.constant 0 : i32
    %c0_i32_0 = arith.constant 0 : i32
    %c0_i32_1 = arith.constant 0 : i32
    return %c0_i32, %c0_i32_0 : i32, i32
  }
  func.func @transform_15(%arg0: i32) -> (i32, i32) {
    %c0_i32 = arith.constant 0 : i32
    %c0_i32_0 = arith.constant 0 : i32
    %c0_i32_1 = arith.constant 0 : i32
    return %c0_i32, %c0_i32_0 : i32, i32
  }
}

</mosaic_0001>

<bundles_post_ra>
// kernel: decoder_layer.1
= control target key start
LH: loop header
LB: loop body
LE: loop exit
PB: predicated region body
PF: predicated region fallthrough
CT: control target
= control target key end

     0   :  { %s2781_s0 = inlined_call_operand.vmem [shape: f32[16,32], index: 0, kind: input, shape index: {}]   ;;  %s2782_s1 = inlined_call_operand.vmem [shape: f32[16,32], index: 1, kind: input, shape index: {}]   ;;  %s2783_s2 = inlined_call_operand.vmem [shape: f32[8,8,8], index: 2, kind: input, shape index: {}]   ;;  %s2784_s3 = inlined_call_operand.vmem [shape: f32[8,8,8], index: 3, kind: input, shape index: {}]   ;;  %s2785_s4 = inlined_call_operand.vmem [shape: f32[6,32,32], index: 4, kind: input, shape index: {}]   ;;  %s2786_s5 = inlined_call_operand.vmem [shape: f32[6,32], index: 5, kind: input, shape index: {}]   ;;  %s2787_s6 = inlined_call_operand.vmem [shape: f32[8,8,32], index: 6, kind: input, shape index: {}]   ;;  %s2788_s7 = inlined_call_operand.vmem [shape: f32[8,8,32], index: 7, kind: input, shape index: {}]   ;;  %s2789_s8 = inlined_call_operand.vmem [shape: f32[2,32], index: 8, kind: input, shape index: {}]   ;;  %s2790_s9 = inlined_call_operand.vmem [shape: f32[32,64], index: 9, kind: input, shape index: {}]   ;;  %s2791_s10 = inlined_call_operand.vmem [shape: f32[1,64], index: 10, kind: input, shape index: {}]   ;;  %s2792_s11 = inlined_call_operand.vmem [shape: f32[64,32], index: 11, kind: input, shape index: {}]   ;;  %s2793_s12 = inlined_call_operand.vmem [shape: f32[1,32], index: 12, kind: input, shape index: {}]   ;;  %s2794_s13 = inlined_call_operand.vmem [shape: f32[3,32], index: 13, kind: input, shape index: {}]   ;;  %s2795_s14 = inlined_call_operand.vmem [shape: f32[3,32], index: 14, kind: input, shape index: {}]   ;;  %s2796_s15 = inlined_call_operand.hbm [shape: f32[16,32], index: 15, kind: output, shape index: {}]  }
   0x1   :  { %v78_v0 = vld [vmem:[%s2785_s4 + $0x18] sm:$0xff]  ;;  %v77_v1 = vld [vmem:[%s2785_s4 + $0x10] sm:$0xff]  ;;  %v76_v2 = vld [vmem:[%s2785_s4 + $0x8] sm:$0xff] }
   0x2   :  { %99 = vmatpush.msra.mxu1 %v78_v0  ;;  %2058 = vmatpush.msra.mxu2 %v78_v0  ;;  %v75_v3 = vld [vmem:[%s2785_s4] sm:$0xff] }
   0x4   :  { %100 = vmatpush.msra.mxu1 %v77_v1  ;;  %2059 = vmatpush.msra.mxu2 %v77_v1 }
   0x5   :  { %20 = vsyncpa [#allocation3], 0  ;;  %v2292_v4 = vld [vmem:[%s2781_s0] sm:$0xff]  ;;  %vm80_vm0 = vcmask 261120   ;;  %v2297_v5 = vld [vmem:[%s2781_s0 + $0x8] sm:$0xff]  ;;  %vm216_vm1 = vcmask 64512  }
   0x6   :  { %101 = vmatpush.msra.mxu1 %v76_v2  ;;  %2060 = vmatpush.msra.mxu2 %v76_v2  ;;  %v1963_v6 = vld [vmem:[%s2785_s4 + $0x38] sm:$0xff]  ;;  %v1962_v7 = vld [vmem:[%s2785_s4 + $0x30] sm:$0xff]  ;;  %v1961_v8 = vld [vmem:[%s2785_s4 + $0x28] sm:$0xff]  ;;  %s2190_s24 = smov 112   ;;  %s2191_s25 = smov 120   ;;  %vm1856_vm15 = vcmask 523264  }
   0x7   :  { %v1960_v9 = vld [vmem:[%s2785_s4 + $0x20] sm:$0xff]  ;;  %v1969_v21 = vld [vmem:[%s2785_s4 + $0x58] sm:$0xff]  ;;  %v1968_v22 = vld [vmem:[%s2785_s4 + $0x50] sm:$0xff]  ;;  %s2195_s22 = smov 128   ;;  %s2196_s23 = smov 8  }
   0x8   :  { %102 = vmatpush.msra.mxu1 %v75_v3  ;;  %2061 = vmatpush.msra.mxu2 %v75_v3  ;;  %v2322_v11 = vld [vmem:[%s2786_s5] sm:$0x3f]  ;;  %s2192_s5 = smov 104   ;;  %v1967_v23 = vld [vmem:[%s2785_s4 + $0x48] sm:$0xff]  ;;  %v62_v57 = vld [vmem:[%s2783_s2 + $0x18] sm:$0xff] }
   0x9   :  { %1958 = vmatmul.msk.f32.vlgmr.msra.gmra.mxu1 %vm80_vm0, %v2292_v4  ;;  %1959 = vmatmul.msk.f32.vlgmr.msra.gmra.mxu2 %vm80_vm0, %v2297_v5  ;;  %v115_v12 = vperm.slane %v2322_v11, 1  ;;  %v79_v14 = vperm.slane %v2322_v11, 0  ;;  %v1966_v24 = vld [vmem:[%s2785_s4 + $0x40] sm:$0xff]  ;;  %v144_v45 = vperm.slane %v2322_v11, 2  ;;  %v60_v50 = vld [vmem:[%s2783_s2 + $0x8] sm:$0xff]  ;;  %v61_v63 = vld [vmem:[%s2783_s2 + $0x10] sm:$0xff] }
   0xa   :  { %128 = vmatpush.msrb.mxu1 %v1963_v6  ;;  %157 = vmatpush.msrb.mxu2 %v1969_v21  ;;  %v59_v34 = vld [vmem:[%s2783_s2] sm:$0xff]  ;;  %v64_v54 = vld [vmem:[%s2783_s2 + $0x28] sm:$0xff]  ;;  %v65_v0 = vld [vmem:[%s2783_s2 + $0x30] sm:$0xff] }
   0xb   :  { %v63_v35 = vld [vmem:[%s2783_s2 + $0x20] sm:$0xff]  ;;  %v66_v2 = vld [vmem:[%s2783_s2 + $0x38] sm:$0xff] }
   0xc   :  { %129 = vmatpush.msrb.mxu1 %v1962_v7  ;;  %158 = vmatpush.msrb.mxu2 %v1968_v22 }
   0xe   :  { %130 = vmatpush.msrb.mxu1 %v1961_v8  ;;  %159 = vmatpush.msrb.mxu2 %v1967_v23 }
  0x10   :  { %131 = vmatpush.msrb.mxu1 %v1960_v9  ;;  %160 = vmatpush.msrb.mxu2 %v1966_v24 }
  0x11   :  { %1964 = vmatmul.msk.f32.vlgmr.msrb.gmra.mxu1 %vm80_vm0, %v2292_v4  ;;  %1970 = vmatmul.msk.f32.vlgmr.msrb.gmra.mxu2 %vm80_vm0, %v2292_v4 }
  0x19   :  { %1965 = vmatmul.msk.f32.gmra.mxu1 %vm80_vm0, %v2297_v5  ;;  %1971 = vmatmul.msk.f32.gmra.mxu2 %vm80_vm0, %v2297_v5 }
  0x86   :  { %v104_v10 = vpop.f32.mrf.mxu1 }
  0x87   :  { %v105_v16 = vadd.f32 %v104_v10, %v79_v14 }
  0x8c   :  { %v107_v17 = vpop.f32.mrf.mxu2 }
  0x8d   :  { %v108_v20 = vadd.f32 %v107_v17, %v79_v14 }
  0x8e   :  { %v133_v13 = vpop.f32.mrf.mxu1 }
  0x8f   :  { %v134_v15 = vadd.f32 %v133_v13, %v115_v12 }
  0x91   :  { %185 = vrot.lane.b32.xlu1 %v134_v15, %s2190_s24  ;;  %183 = vrot.lane.b32.xlu0 %v134_v15, %s2191_s25 }
  0x92   :  { %1972 = vmatpush.xpose.msk.msra.mxu3 %vm216_vm1, %v134_v15 }
  0x94   :  { %v162_v46 = vpop.f32.mrf.mxu2 }
  0x95   :  { %1973 = vmatmul.msk.f32.vlgmr.msra.gmra.mxu3 %vm216_vm1, %v105_v16  ;;  %v2385_v47 = vadd.f32 %v162_v46, %v144_v45 }
  0x96   :  { %v136_v18 = vpop.f32.mrf.mxu1 }
  0x97   :  { %v137_v19 = vadd.f32 %v136_v18, %v115_v12 }
  0x99   :  { %190 = vrot.lane.b32.xlu2 %v137_v19, %s2191_s25  ;;  %1980 = vmatpush.xpose.msk.msra.mxu1 %vm216_vm1, %v137_v19 }
  0x9a   :  { %171 = vrot.lane.b32.xlu1 %v105_v16, %s2190_s24  ;;  %169 = vrot.lane.b32.xlu0 %v105_v16, %s2191_s25 }
  0x9c   :  { %1981 = vmatmul.msk.f32.vlgmr.msra.gmra.mxu1 %vm216_vm1, %v108_v20  ;;  %v165_v48 = vpop.f32.mrf.mxu2 }
  0x9d   :  { %515 = vmatpush.msrb.mxu1 %v2385_v47  ;;  %v2388_v49 = vadd.f32 %v165_v48, %v144_v45 }
  0x9f   :  { %607 = vmatpush.msra.mxu1 %v2388_v49 }
  0xa1   :  { %192 = vrot.lane.b32.xlu2 %v137_v19, %s2190_s24 }
  0xa2   :  { %178 = vrot.lane.b32.xlu1 %v108_v20, %s2190_s24  ;;  %176 = vrot.lane.b32.xlu0 %v108_v20, %s2191_s25 }
  0xa9   :  { %187 = vrot.lane.b32.xlu2 %v134_v15, %s2192_s5 }
  0xaa   :  { %173 = vrot.lane.b32.xlu0 %v105_v16, %s2192_s5  ;;  %194 = vrot.lane.b32.xlu1 %v137_v19, %s2192_s5 }
  0xb1   :  { %180 = vrot.lane.b32.xlu2 %v108_v20, %s2192_s5 }
  0xf3   :  { %v191_v25 = vpop.permute.xlu2 %190 }
  0xf4   :  { %1982 = vmatpush.xpose.msk.msra.mxu2 %vm216_vm1, %v191_v25 }
  0xfb   :  { %v193_v26 = vpop.permute.xlu2 %192 }
 0x103   :  { %v188_v27 = vpop.permute.xlu2 %187  ;;  %v186_v28 = vpop.permute.xlu1 %185 }
 0x104   :  { %v184_v29 = vpop.permute.xlu0 %183  ;;  %1978 = vmatpush.xpose.msk.msra.mxu0 %vm216_vm1, %v188_v27 }
 0x105   :  { %1974 = vmatpush.xpose.msk.msrb.mxu3 %vm216_vm1, %v184_v29 }
 0x109   :  { %1976 = vmatpush.xpose.msk.msra.mxu3 %vm216_vm1, %v186_v28 }
 0x10b   :  { %v181_v44 = vpop.permute.xlu2 %180 }
 0x10c   :  { %v172_v30 = vpop.permute.xlu1 %171  ;;  %v170_v31 = vpop.permute.xlu0 %169 }
 0x10d   :  { %1975 = vmatmul.msk.f32.vlgmr.msrb.gmra.mxu3 %vm216_vm1, %v170_v31 }
 0x10e   :  { %1984 = vmatpush.xpose.msk.msrb.mxu3 %vm216_vm1, %v193_v26 }
 0x114   :  { %v179_v32 = vpop.permute.xlu1 %178  ;;  %v177_v33 = vpop.permute.xlu0 %176 }
 0x115   :  { %1977 = vmatmul.msk.f32.vlgmr.msra.gmra.mxu3 %vm216_vm1, %v172_v30  ;;  %1983 = vmatmul.msk.f32.vlgmr.msra.gmra.mxu2 %vm216_vm1, %v177_v33 }
 0x118   :  { %v238_v36 = vpop.f32.mrf.mxu3 }
 0x119   :  { %v2372_v37 = vadd.f32 %v238_v36, %v59_v34  ;;  %v334_v38 = vpop.f32.mrf.mxu1  ;;  %v2069_v36 = vpack.i.bf16 %v2388_v49, %v2385_v47 }
 0x11a   :  { %v2374_v39 = vadd.f32 %v334_v38, %v63_v35 }
 0x11b   :  { %v409_v40 = vsel %vm216_vm1, %v2372_v37, -inf }
 0x11c   :  { %v174_v41 = vpop.permute.xlu0 %173  ;;  %410 = vmax.xlane.f32.xlu0 %v409_v40  ;;  %v421_v42 = vsel %vm216_vm1, %v2374_v39, -inf  ;;  %v195_v43 = vpop.permute.xlu1 %194 }
 0x11d   :  { %1979 = vmatmul.msk.f32.vlgmr.msra.gmra.mxu0 %vm216_vm1, %v174_v41  ;;  %1985 = vmatmul.msk.f32.vlgmr.msrb.gmra.mxu3 %vm216_vm1, %v179_v32 }
 0x11e   :  { %422 = vmax.xlane.f32.xlu2 %v421_v42  ;;  %1986 = vmatpush.xpose.msk.msrb.mxu0 %vm216_vm1, %v195_v43 }
 0x125   :  { %1987 = vmatmul.msk.f32.vlgmr.msrb.gmra.mxu0 %vm216_vm1, %v181_v44 }
 0x18f   :  { %v411_v13 = vpop.xlane.xlu0 %410 }
 0x190   :  { %v262_v51 = vpop.f32.mrf.mxu3  ;;  %v433_v28 = vsub.f32 %v2372_v37, %v411_v13 }
 0x191   :  { %v263_v52 = vadd.f32 %v262_v51, %v60_v50  ;;  %v423_v14 = vpop.xlane.xlu2 %422 }
 0x192   :  { %v441_v30 = vmul.f32 1.442695, %v433_v28  ;;  %v437_v41 = vsub.f32 %v2374_v39, %v423_v14  ;;  %v72_v28 = vld [vmem:[%s2787_s6 + $0x28] sm:$0xff] }
 0x193   :  { %v412_v53 = vsel %vm216_vm1, %v263_v52, -inf }
 0x194   :  { %413 = vmax.xlane.f32.xlu0 %v412_v53  ;;  %v449_v44 = vmul.f32 1.442695, %v437_v41 }
 0x198   :  { %v286_v55 = vpop.f32.mrf.mxu3  ;;  %v358_v56 = vpop.f32.mrf.mxu2 }
 0x199   :  { %v359_v58 = vadd.f32 %v358_v56, %v64_v54  ;;  %v287_v3 = vadd.f32 %v286_v55, %v61_v63 }
 0x19a   :  { %v310_v59 = vpop.f32.mrf.mxu0 }
 0x19b   :  { %v311_v60 = vadd.f32 %v310_v59, %v62_v57  ;;  %v424_v61 = vsel %vm216_vm1, %v359_v58, -inf  ;;  %v415_v10 = vsel %vm216_vm1, %v287_v3, -inf }
 0x19c   :  { %425 = vmax.xlane.f32.xlu2 %v424_v61 }
 0x19d   :  { %v418_v62 = vsel %vm216_vm1, %v311_v60, -inf }
 0x19e   :  { %419 = vmax.xlane.f32.xlu1 %v418_v62 }
 0x1a0   :  { %v382_v1 = vpop.f32.mrf.mxu3 }
 0x1a1   :  { %v2412_v6 = vadd.f32 %v382_v1, %v65_v0 }
 0x1a2   :  { %v406_v7 = vpop.f32.mrf.mxu0 }
 0x1a3   :  { %v407_v8 = vadd.f32 %v406_v7, %v66_v2  ;;  %v427_v9 = vsel %vm216_vm1, %v2412_v6, -inf }
 0x1a4   :  { %428 = vmax.xlane.f32.xlu2 %v427_v9 }
 0x1a5   :  { %v430_v12 = vsel %vm216_vm1, %v407_v8, -inf }
 0x1a6   :  { %416 = vmax.xlane.f32.xlu1 %v415_v10  ;;  %431 = vmax.xlane.f32.xlu0 %v430_v12 }
 0x207   :  { %v414_v15 = vpop.xlane.xlu0 %413 }
 0x208   :  { %v434_v16 = vsub.f32 %v263_v52, %v414_v15 }
 0x20a   :  { %v443_v17 = vmul.f32 1.442695, %v434_v16 }
 0x20c   :  { %2086 = vpow2.f32 %v443_v17 }
 0x20f   :  { %v426_v18 = vpop.xlane.xlu2 %425 }
 0x210   :  { %v438_v19 = vsub.f32 %v359_v58, %v426_v18 }
 0x211   :  { %v420_v20 = vpop.xlane.xlu1 %419 }
 0x212   :  { %v2418_v21 = vpop.eup %2086  ;;  %v451_v22 = vmul.f32 1.442695, %v438_v19  ;;  %v436_v32 = vsub.f32 %v311_v60, %v420_v20 }
 0x213   :  { %v460_v23 = vsel %vm216_vm1, %v2418_v21, 0.0 }
 0x214   :  { %2088 = vpow2.f32 %v451_v22  ;;  %461 = vadd.xlane.f32.xlu1 %v460_v23  ;;  %v447_v34 = vmul.f32 1.442695, %v436_v32 }
 0x217   :  { %v429_v52 = vpop.xlane.xlu2 %428 }
 0x218   :  { %v439_v39 = vsub.f32 %v2412_v6, %v429_v52 }
 0x219   :  { %v417_v24 = vpop.xlane.xlu1 %416  ;;  %v432_v42 = vpop.xlane.xlu0 %431 }
 0x21a   :  { %v2422_v25 = vpop.eup %2088  ;;  %v435_v26 = vsub.f32 %v287_v3, %v417_v24  ;;  %v440_v43 = vsub.f32 %v407_v8, %v432_v42  ;;  %v453_v53 = vmul.f32 1.442695, %v439_v39 }
 0x21b   :  { %v472_v27 = vsel %vm216_vm1, %v2422_v25, 0.0 }
 0x21c   :  { %v445_v29 = vmul.f32 1.442695, %v435_v26  ;;  %473 = vadd.xlane.f32.xlu0 %v472_v27  ;;  %v455_v45 = vmul.f32 1.442695, %v440_v43  ;;  %v67_v26 = vld [vmem:[%s2787_s6] sm:$0xff]  ;;  %v69_v27 = vld [vmem:[%s2787_s6 + $0x10] sm:$0xff] }
 0x21e   :  { %2090 = vpow2.f32 %v445_v29  ;;  %v70_v29 = vld [vmem:[%s2787_s6 + $0x18] sm:$0xff] }
 0x21f   :  { %2092 = vpow2.f32 %v441_v30 }
 0x220   :  { %2094 = vpow2.f32 %v447_v34 }
 0x221   :  { %2096 = vpow2.f32 %v449_v44 }
 0x222   :  { %2098 = vpow2.f32 %v455_v45  ;;  %v2488_v45 = vld [vmem:[%s2789_s8] sm:$0x3] }
 0x223   :  { %2100 = vpow2.f32 %v453_v53 }
 0x224   :  { %v2091_v31 = vpop.eup %2090 }
 0x225   :  { %v463_v33 = vsel %vm216_vm1, %v2091_v31, 0.0  ;;  %v2093_v35 = vpop.eup %2092 }
 0x226   :  { %464 = vadd.xlane.f32.xlu2 %v463_v33  ;;  %v457_v37 = vsel %vm216_vm1, %v2093_v35, 0.0  ;;  %v2095_v38 = vpop.eup %2094 }
 0x227   :  { %v466_v40 = vsel %vm216_vm1, %v2095_v38, 0.0  ;;  %v2097_v46 = vpop.eup %2096 }
 0x228   :  { %v2099_v48 = vpop.eup %2098  ;;  %v469_v50 = vsel %vm216_vm1, %v2097_v46, 0.0 }
 0x229   :  { %v478_v51 = vsel %vm216_vm1, %v2099_v48, 0.0  ;;  %v2101_v54 = vpop.eup %2100 }
 0x22a   :  { %v475_v55 = vsel %vm216_vm1, %v2101_v54, 0.0 }
 0x22d   :  { %2070 = vrot.lane.b32.xlu1 %v2069_v36, %s2191_s25 }
 0x22e   :  { %458 = vadd.xlane.f32.xlu2 %v457_v37  ;;  %v74_v37 = vld [vmem:[%s2787_s6 + $0x38] sm:$0xff] }
 0x230   :  { %2075 = vrot.lane.b32.xlu0 %v2069_v36, %s2190_s24 }
 0x236   :  { %467 = vadd.xlane.f32.xlu2 %v466_v40 }
 0x24e   :  { %203 = vrot.lane.b32.xlu2 %v2385_v47, %s2192_s5 }
 0x257   :  { %470 = vadd.xlane.f32.xlu1 %v469_v50 }
 0x25a   :  { %479 = vadd.xlane.f32.xlu0 %v478_v51  ;;  %v871_v51 = vperm.slane %v2488_v45, 0 }
 0x277   :  { %476 = vadd.xlane.f32.xlu2 %v475_v55 }
 0x287   :  { %v462_v47 = vpop.xlane.xlu1 %461 }
 0x288   :  { %2102 = vrcp.f32 %v462_v47 }
 0x28e   :  { %v2103_v58 = vpop.eup %2102 }
 0x28f   :  { %213 = vrot.lane.b32.xlu2 %v2388_v49, %s2192_s5  ;;  %v474_v57 = vpop.xlane.xlu0 %473  ;;  %v490_v63 = vmul.f32 %v2103_v58, %v2418_v21 }
 0x299   :  { %v465_v56 = vpop.xlane.xlu2 %464 }
 0x29a   :  { %2104 = vrcp.f32 %v465_v56 }
 0x29b   :  { %2106 = vrcp.f32 %v474_v57 }
 0x29f   :  { %v2071_v59 = vpop.permute.xlu1 %2070 }
 0x2a0   :  { %v2073_v60 = vunpack.i.h.bf16 %v2071_v59  ;;  %v2072_v61 = vunpack.i.l.bf16 %v2071_v59  ;;  %v2105_v62 = vpop.eup %2104 }
 0x2a1   :  { %v459_v0 = vpop.xlane.xlu2 %458  ;;  %v491_v49 = vmul.f32 %v2105_v62, %v2091_v31  ;;  %v2107_v6 = vpop.eup %2106 }
 0x2a2   :  { %2108 = vrcp.f32 %v459_v0  ;;  %538 = vmatpush.msrb.mxu2 %v2072_v61  ;;  %v2076_v1 = vpop.permute.xlu0 %2075  ;;  %v494_v8 = vmul.f32 %v2107_v6, %v2422_v25  ;;  %v68_v25 = vld [vmem:[%s2787_s6 + $0x8] sm:$0xff]  ;;  %v2193_v0 = vmov 32.0  }
 0x2a3   :  { %v2078_v2 = vunpack.i.h.bf16 %v2076_v1  ;;  %v2077_v3 = vunpack.i.l.bf16 %v2076_v1  ;;  %1989 = vmatmul.msk.f32.vlgmr.msrb.gmra.mxu2 %vm216_vm1, %v490_v63 }
 0x2a4   :  { %630 = vmatpush.msra.mxu2 %v2073_v60 }
 0x2a5   :  { %561 = vmatpush.msra.mxu3 %v2077_v3 }
 0x2a6   :  { %1990 = vmatmul.msk.f32.vlgmr.msra.gmra.mxu3 %vm216_vm1, %v491_v49  ;;  %722 = vmatpush.msrb.mxu2 %v68_v25  ;;  %v2005_v25 = vld [vmem:[%s2785_s4 + $0x68] sm:$0xff] }
 0x2a7   :  { %653 = vmatpush.msrb.mxu3 %v2078_v2 }
 0x2a8   :  { %v2109_v7 = vpop.eup %2108 }
 0x2a9   :  { %v489_v9 = vmul.f32 %v2109_v7, %v2093_v35  ;;  %v468_v10 = vpop.xlane.xlu2 %467  ;;  %745 = vmatpush.msra.mxu3 %v69_v27  ;;  %v71_v35 = vld [vmem:[%s2787_s6 + $0x20] sm:$0xff] }
 0x2aa   :  { %2110 = vrcp.f32 %v468_v10 }
 0x2ab   :  { %1988 = vmatmul.msk.f32.vlgmr.msrb.gmra.mxu1 %vm216_vm1, %v489_v9  ;;  %1993 = vmatmul.msk.f32.vlgmr.msra.gmra.mxu2 %vm216_vm1, %v494_v8 }
 0x2ac   :  { %699 = vmatpush.msrb.mxu1 %v67_v26  ;;  %814 = vmatpush.msra.mxu2 %v72_v28  ;;  %v2004_v26 = vld [vmem:[%s2785_s4 + $0x60] sm:$0xff] }
 0x2b0   :  { %v2111_v12 = vpop.eup %2110 }
 0x2b1   :  { %v492_v13 = vmul.f32 %v2111_v12, %v2095_v38  ;;  %v204_v14 = vpop.permute.xlu2 %203  ;;  %v73_v38 = vld [vmem:[%s2787_s6 + $0x30] sm:$0xff]  ;;  %v2013_v12 = vld [vmem:[%s2785_s4 + $0x98] sm:$0xff] }
 0x2b2   :  { %584 = vmatpush.msra.mxu0 %v204_v14  ;;  %v2011_v14 = vld [vmem:[%s2785_s4 + $0x88] sm:$0xff] }
 0x2b3   :  { %1991 = vmatmul.msk.f32.vlgmr.msra.gmra.mxu0 %vm216_vm1, %v492_v13  ;;  %v2012_v13 = vld [vmem:[%s2785_s4 + $0x90] sm:$0xff] }
 0x2ca   :  { %v471_v15 = vpop.xlane.xlu1 %470 }
 0x2cb   :  { %2112 = vrcp.f32 %v471_v15  ;;  %v2010_v15 = vld [vmem:[%s2785_s4 + $0x80] sm:$0xff] }
 0x2cd   :  { %v480_v18 = vpop.xlane.xlu0 %479 }
 0x2ce   :  { %2114 = vrcp.f32 %v480_v18 }
 0x2d1   :  { %v2113_v16 = vpop.eup %2112 }
 0x2d2   :  { %v493_v17 = vmul.f32 %v2113_v16, %v2097_v46  ;;  %v2514_v16 = vld [vmem:[%s2782_s1] sm:$0xff] }
 0x2d4   :  { %1992 = vmatmul.msk.f32.vlgmr.msra.gmra.mxu1 %vm216_vm1, %v493_v17  ;;  %v2115_v20 = vpop.eup %2114 }
 0x2d5   :  { %v496_v22 = vmul.f32 %v2115_v20, %v2099_v48  ;;  %791 = vmatpush.msra.mxu1 %v71_v35 }
 0x2ea   :  { %v477_v19 = vpop.xlane.xlu2 %476 }
 0x2eb   :  { %2116 = vrcp.f32 %v477_v19 }
 0x2ec   :  { %2118 = vrcp.f32 %v2193_v0  ;;  %v2019_v0 = vld [vmem:[%s2785_s4 + $0xb8] sm:$0xff] }
 0x2f1   :  { %v2117_v21 = vpop.eup %2116 }
 0x2f2   :  { %v495_v23 = vmul.f32 %v2117_v21, %v2101_v54  ;;  %v214_v24 = vpop.permute.xlu2 %213  ;;  %v2119_v1 = vpop.eup %2118 }
 0x2f3   :  { %676 = vmatpush.msrb.mxu0 %v214_v24  ;;  %vm887_vm2 = vweird.f32 %v2119_v1  ;;  %v2006_v24 = vld [vmem:[%s2785_s4 + $0x70] sm:$0xff] }
 0x2f4   :  { %1994 = vmatmul.msk.f32.vlgmr.msrb.gmra.mxu3 %vm216_vm1, %v495_v23  ;;  %1995 = vmatmul.msk.f32.vlgmr.msrb.gmra.mxu0 %vm216_vm1, %v496_v22  ;;  %v2523_v22 = vld [vmem:[%s2782_s1 + $0x8] sm:$0xff]  ;;  %v2007_v23 = vld [vmem:[%s2785_s4 + $0x78] sm:$0xff]  ;;  %s1946_s1 = sshll.u32 %s2796_s15, 4  ;;  %s1947_s1 = int_to_ptr.hbm [resolvable:$true] %s1946_s1 }
 0x2f5   :  { %768 = vmatpush.msra.mxu0 %v70_v29  ;;  %837 = vmatpush.msrb.mxu3 %v73_v38 }
 0x2f7   :  { %860 = vmatpush.msrb.mxu0 %v74_v37  ;;  %v2548_v37 = vld [vmem:[%s2795_s14] sm:$0x7] }
 0x326   :  { %v540_v30 = vpop.f32.mrf.mxu2 }
 0x327   :  { %1997 = vmatmul.msk.f32.vlgmr.msrb.gmra.mxu2 %vm216_vm1, %v540_v30 }
 0x328   :  { %v517_v31 = vpop.f32.mrf.mxu1  ;;  %1008 = vmatpush.msrb.mxu2 %v2013_v12 }
 0x329   :  { %v563_v32 = vpop.f32.mrf.mxu3  ;;  %1996 = vmatmul.msk.f32.vlgmr.msrb.gmra.mxu1 %vm216_vm1, %v517_v31 }
 0x32a   :  { %1998 = vmatmul.msk.f32.vlgmr.msra.gmra.mxu3 %vm216_vm1, %v563_v32  ;;  %1009 = vmatpush.msrb.mxu2 %v2012_v13 }
 0x32b   :  { %973 = vmatpush.msrb.mxu1 %v2007_v23  ;;  %1037 = vmatpush.msra.mxu3 %v2019_v0  ;;  %v1024_v23 = vperm.slane %v2322_v11, 5 }
 0x32c   :  { %1010 = vmatpush.msrb.mxu2 %v2011_v14 }
 0x32d   :  { %974 = vmatpush.msrb.mxu1 %v2006_v24 }
 0x32e   :  { %v632_v33 = vpop.f32.mrf.mxu2  ;;  %1011 = vmatpush.msrb.mxu2 %v2010_v15 }
 0x32f   :  { %2001 = vmatmul.msk.f32.vlgmr.msra.gmra.mxu2 %vm216_vm1, %v632_v33  ;;  %975 = vmatpush.msrb.mxu1 %v2005_v25 }
 0x330   :  { %v586_v34 = vpop.f32.mrf.mxu0 }
 0x331   :  { %1999 = vmatmul.msk.f32.vlgmr.msra.gmra.mxu0 %vm216_vm1, %v586_v34  ;;  %976 = vmatpush.msrb.mxu1 %v2004_v26  ;;  %v2543_v34 = vld [vmem:[%s2794_s13] sm:$0x7] }
 0x332   :  { %v927_v38 = vperm.slane %v2543_v34, 0 }
 0x337   :  { %2014 = vmatmul.msk.f32.vlgmr.msrb.gmra.mxu2 %vm80_vm0, %v2514_v16 }
 0x33f   :  { %2015 = vmatmul.msk.f32.gmra.mxu2 %vm80_vm0, %v2523_v22 }
 0x351   :  { %v609_v36 = vpop.f32.mrf.mxu1 }
 0x352   :  { %2000 = vmatmul.msk.f32.vlgmr.msra.gmra.mxu1 %vm216_vm1, %v609_v36 }
 0x371   :  { %v678_v40 = vpop.f32.mrf.mxu0 }
 0x372   :  { %2003 = vmatmul.msk.f32.vlgmr.msrb.gmra.mxu0 %vm216_vm1, %v678_v40 }
 0x377   :  { %v655_v41 = vpop.f32.mrf.mxu3 }
 0x378   :  { %2002 = vmatmul.msk.f32.vlgmr.msrb.gmra.mxu3 %vm216_vm1, %v655_v41 }
 0x3a6   :  { %v701_v42 = vpop.f32.mrf.mxu1 }
 0x3aa   :  { %v724_v43 = vpop.f32.mrf.mxu2 }
 0x3ab   :  { %v865_v44 = vadd.f32 %v724_v43, %v701_v42  ;;  %v930_v42 = vperm.slane %v2548_v37, 0 }
 0x3ad   :  { %v747_v46 = vpop.f32.mrf.mxu3 }
 0x3ae   :  { %v867_v48 = vadd.f32 %v865_v44, %v747_v46  ;;  %v770_v50 = vpop.f32.mrf.mxu0  ;;  %v989_v46 = vperm.slane %v2322_v11, 4 }
 0x3b0   :  { %v869_v52 = vadd.f32 %v867_v48, %v770_v50 }
 0x3b2   :  { %v872_v39 = vadd.f32 %v871_v51, %v869_v52  ;;  %v816_v47 = vpop.f32.mrf.mxu2 }
 0x3b4   :  { %v874_v53 = vadd.f32 %v872_v39, %v2292_v4  ;;  %v883_v4 = vmul.f32 32.0, %v2119_v1 }
 0x3b6   :  { %v876_v54 = vsel %vm80_vm0, %v874_v53, 0.0  ;;  %v884_v2 = vsub.f32 1.0, %v883_v4  ;;  %v2017_v4 = vld [vmem:[%s2785_s4 + $0xa8] sm:$0xff] }
 0x3b7   :  { %877 = vadd.xlane.f32.xlu2 %v876_v54 }
 0x3b8   :  { %v885_v3 = vmul.f32 %v2119_v1, %v884_v2  ;;  %v2016_v2 = vld [vmem:[%s2785_s4 + $0xa0] sm:$0xff] }
 0x3ba   :  { %v886_v49 = vadd.f32 %v2119_v1, %v885_v3  ;;  %v1013_v48 = vpop.f32.mrf.mxu2  ;;  %v954_v3 = vperm.slane %v2322_v11, 3  ;;  %v937_v11 = vld [vmem:[%s2784_s3 + $0x20] sm:$0xff] }
 0x3bb   :  { %v1014_v50 = vadd.f32 %v1013_v48, %v989_v46 }
 0x3bc   :  { %v2495_v6 = vsel %vm887_vm2, %v2119_v1, %v886_v49  ;;  %v2018_v1 = vld [vmem:[%s2785_s4 + $0xb0] sm:$0xff] }
 0x3bd   :  { %2022 = vmatpush.xpose.msk.msra.mxu0 %vm216_vm1, %v1014_v50  ;;  %1038 = vmatpush.msra.mxu3 %v2018_v1  ;;  %v940_v1 = vld [vmem:[%s2784_s3 + $0x38] sm:$0xff] }
 0x3bf   :  { %1039 = vmatpush.msra.mxu3 %v2017_v4 }
 0x3c1   :  { %1040 = vmatpush.msra.mxu3 %v2016_v2 }
 0x3c2   :  { %2020 = vmatmul.msk.f32.vlgmr.msra.gmra.mxu3 %vm80_vm0, %v2514_v16 }
 0x3ca   :  { %2021 = vmatmul.msk.f32.gmra.mxu3 %vm80_vm0, %v2523_v22 }
 0x3cf   :  { %v793_v55 = vpop.f32.mrf.mxu1 }
 0x3d0   :  { %v866_v56 = vadd.f32 %v816_v47, %v793_v55 }
 0x3ef   :  { %v862_v59 = vpop.f32.mrf.mxu0 }
 0x3fb   :  { %v839_v57 = vpop.f32.mrf.mxu3 }
 0x3fc   :  { %v868_v58 = vadd.f32 %v866_v56, %v839_v57 }
 0x3fe   :  { %v870_v60 = vadd.f32 %v868_v58, %v862_v59 }
 0x400   :  { %v873_v61 = vadd.f32 %v871_v51, %v870_v60 }
 0x402   :  { %v875_v62 = vadd.f32 %v873_v61, %v2297_v5 }
 0x404   :  { %v879_v63 = vsel %vm80_vm0, %v875_v62, 0.0 }
 0x405   :  { %880 = vadd.xlane.f32.xlu1 %v879_v63 }
 0x42a   :  { %v878_v7 = vpop.xlane.xlu2 %877 }
 0x42b   :  { %v889_v8 = vmul.f32 %v2495_v6, %v878_v7 }
 0x42d   :  { %v891_v9 = vsub.f32 %v874_v53, %v889_v8 }
 0x42f   :  { %v893_v10 = vmul.f32 %v891_v9, %v891_v9 }
 0x431   :  { %v895_v5 = vsel %vm80_vm0, %v893_v10, 0.0 }
 0x432   :  { %896 = vadd.xlane.f32.xlu0 %v895_v5 }
 0x445   :  { %v1042_v24 = vpop.f32.mrf.mxu3 }
 0x446   :  { %1067 = vrot.lane.b32.xlu0 %v1014_v50, %s2192_s5  ;;  %v2609_v25 = vadd.f32 %v1042_v24, %v1024_v23 }
 0x478   :  { %v881_v17 = vpop.xlane.xlu1 %880 }
 0x479   :  { %v890_v18 = vmul.f32 %v2495_v6, %v881_v17  ;;  %v933_v17 = vld [vmem:[%s2784_s3] sm:$0xff] }
 0x47b   :  { %v892_v19 = vsub.f32 %v875_v62, %v890_v18  ;;  %v1016_v62 = vpop.f32.mrf.mxu2 }
 0x47c   :  { %v1017_v63 = vadd.f32 %v1016_v62, %v989_v46 }
 0x47d   :  { %v894_v20 = vmul.f32 %v892_v19, %v892_v19 }
 0x47e   :  { %1074 = vrot.lane.b32.xlu0 %v1017_v63, %s2192_s5  ;;  %2030 = vmatpush.xpose.msk.msrb.mxu3 %vm216_vm1, %v1017_v63 }
 0x47f   :  { %v898_v21 = vsel %vm80_vm0, %v894_v20, 0.0 }
 0x480   :  { %899 = vadd.xlane.f32.xlu1 %v898_v21 }
 0x482   :  { %1394 = vmatpush.msra.mxu3 %v2609_v25 }
 0x486   :  { %1063 = vrot.lane.b32.xlu0 %v1014_v50, %s2191_s25 }
 0x4a5   :  { %v897_v27 = vpop.xlane.xlu0 %896 }
 0x4a6   :  { %v901_v28 = vmul.f32 %v897_v27, %v2495_v6  ;;  %v1045_v27 = vpop.f32.mrf.mxu3 }
 0x4a8   :  { %v903_v29 = vadd.f32 1e-05, %v901_v28  ;;  %v2613_v28 = vadd.f32 %v1045_v27, %v1024_v23 }
 0x4aa   :  { %2120 = vrsqrt.f32 %v903_v29  ;;  %vm911_vm4 = vweird.f32 %v903_v29 }
 0x4b0   :  { %v2121_v30 = vpop.eup %2120 }
 0x4b1   :  { %v906_v31 = vmul.f32 %v2121_v30, %v903_v29  ;;  %vm912_vm3 = vweird.f32 %v2121_v30 }
 0x4b2   :  { %vm913_vm5 = vmor %vm911_vm4, %vm912_vm3 }
 0x4b3   :  { %v907_v32 = vmul.f32 %v2121_v30, %v906_v31 }
 0x4b5   :  { %v908_v33 = vmul.f32 0.5, %v907_v32 }
 0x4b7   :  { %v909_v35 = vsub.f32 1.5, %v908_v33 }
 0x4b8   :  { %v1068_v8 = vpop.permute.xlu0 %1067 }
 0x4b9   :  { %v910_v36 = vmul.f32 %v2121_v30, %v909_v35  ;;  %2028 = vmatpush.xpose.msk.msra.mxu2 %vm216_vm1, %v1068_v8  ;;  %v934_v35 = vld [vmem:[%s2784_s3 + $0x8] sm:$0xff] }
 0x4bb   :  { %v914_v40 = vsel %vm913_vm5, %v2121_v30, %v910_v36 }
 0x4bc   :  { %v925_v41 = vmul.f32 %v914_v40, %v891_v9 }
 0x4be   :  { %v928_v43 = vmul.f32 %v927_v38, %v925_v41  ;;  %v936_v41 = vld [vmem:[%s2784_s3 + $0x18] sm:$0xff] }
 0x4c0   :  { %v2552_v44 = vadd.f32 %v930_v42, %v928_v43 }
 0x4c2   :  { %2008 = vmatmul.msk.f32.vlgmr.msrb.gmra.mxu1 %vm80_vm0, %v2552_v44 }
 0x4f0   :  { %v1075_v9 = vpop.permute.xlu0 %1074 }
 0x4f1   :  { %2036 = vmatpush.xpose.msk.msrb.mxu2 %vm216_vm1, %v1075_v9 }
 0x4f3   :  { %v900_v51 = vpop.xlane.xlu1 %899 }
 0x4f4   :  { %v902_v52 = vmul.f32 %v900_v51, %v2495_v6 }
 0x4f6   :  { %v904_v39 = vadd.f32 1e-05, %v902_v52  ;;  %v935_v52 = vld [vmem:[%s2784_s3 + $0x10] sm:$0xff] }
 0x4f8   :  { %2122 = vrsqrt.f32 %v904_v39  ;;  %vm921_vm7 = vweird.f32 %v904_v39  ;;  %v1064_v5 = vpop.permute.xlu0 %1063 }
 0x4f9   :  { %2024 = vmatpush.xpose.msk.msrb.mxu0 %vm216_vm1, %v1064_v5 }
 0x4fe   :  { %v2123_v53 = vpop.eup %2122 }
 0x4ff   :  { %v916_v54 = vmul.f32 %v2123_v53, %v904_v39  ;;  %vm922_vm6 = vweird.f32 %v2123_v53 }
 0x500   :  { %vm923_vm8 = vmor %vm921_vm7, %vm922_vm6 }
 0x501   :  { %v917_v55 = vmul.f32 %v2123_v53, %v916_v54 }
 0x503   :  { %v918_v47 = vmul.f32 0.5, %v917_v55 }
 0x505   :  { %v919_v56 = vsub.f32 1.5, %v918_v47 }
 0x507   :  { %v920_v57 = vmul.f32 %v2123_v53, %v919_v56  ;;  %v938_v56 = vld [vmem:[%s2784_s3 + $0x28] sm:$0xff] }
 0x509   :  { %v924_v58 = vsel %vm923_vm8, %v2123_v53, %v920_v57 }
 0x50a   :  { %v926_v59 = vmul.f32 %v924_v58, %v892_v19 }
 0x50c   :  { %v929_v60 = vmul.f32 %v927_v38, %v926_v59 }
 0x50e   :  { %v2560_v61 = vadd.f32 %v930_v42, %v929_v60  ;;  %v939_v60 = vld [vmem:[%s2784_s3 + $0x30] sm:$0xff] }
 0x510   :  { %2009 = vmatmul.msk.f32.gmra.mxu1 %vm80_vm0, %v2560_v61 }
 0x53f   :  { %v978_v49 = vpop.f32.mrf.mxu1 }
 0x540   :  { %v979_v7 = vadd.f32 %v978_v49, %v954_v3  ;;  %v2079_v49 = vpack.i.bf16 %v2613_v28, %v2609_v25 }
 0x542   :  { %1049 = vrot.lane.b32.xlu0 %v979_v7, %s2191_s25  ;;  %2023 = vmatmul.msk.f32.vlgmr.msra.gmra.mxu0 %vm216_vm1, %v979_v7 }
 0x543   :  { %1053 = vrot.lane.b32.xlu1 %v979_v7, %s2192_s5 }
 0x54a   :  { %1070 = vrot.lane.b32.xlu0 %v1017_v63, %s2191_s25 }
 0x54b   :  { %1065 = vrot.lane.b32.xlu1 %v1014_v50, %s2190_s24 }
 0x553   :  { %1051 = vrot.lane.b32.xlu1 %v979_v7, %s2190_s24 }
 0x55b   :  { %1072 = vrot.lane.b32.xlu1 %v1017_v63, %s2190_s24 }
 0x58d   :  { %v981_v10 = vpop.f32.mrf.mxu1 }
 0x58e   :  { %v982_v12 = vadd.f32 %v981_v10, %v954_v3 }
 0x590   :  { %1058 = vrot.lane.b32.xlu0 %v982_v12, %s2190_s24  ;;  %1060 = vrot.lane.b32.xlu2 %v982_v12, %s2192_s5 }
 0x591   :  { %2031 = vmatmul.msk.f32.vlgmr.msrb.gmra.mxu3 %vm216_vm1, %v982_v12 }
 0x592   :  { %1486 = vmatpush.msrb.mxu3 %v2613_v28 }
 0x598   :  { %1056 = vrot.lane.b32.xlu2 %v982_v12, %s2191_s25 }
 0x5b4   :  { %v1050_v13 = vpop.permute.xlu0 %1049 }
 0x5b5   :  { %v1054_v14 = vpop.permute.xlu1 %1053  ;;  %2025 = vmatmul.msk.f32.vlgmr.msrb.gmra.mxu0 %vm216_vm1, %v1050_v13 }
 0x5b6   :  { %2029 = vmatmul.msk.f32.vlgmr.msra.gmra.mxu2 %vm216_vm1, %v1054_v14 }
 0x5bc   :  { %v1071_v15 = vpop.permute.xlu0 %1070 }
 0x5bd   :  { %v1066_v16 = vpop.permute.xlu1 %1065  ;;  %2032 = vmatpush.xpose.msk.msra.mxu0 %vm216_vm1, %v1071_v15 }
 0x5be   :  { %2026 = vmatpush.xpose.msk.msra.mxu1 %vm216_vm1, %v1066_v16 }
 0x5bf   :  { %v1117_v18 = vpop.f32.mrf.mxu0 }
 0x5c0   :  { %v1118_v19 = vadd.f32 %v1117_v18, %v933_v17 }
 0x5c2   :  { %v1288_v20 = vsel %vm216_vm1, %v1118_v19, -inf }
 0x5c3   :  { %1289 = vmax.xlane.f32.xlu1 %v1288_v20 }
 0x5c5   :  { %v1052_v21 = vpop.permute.xlu1 %1051 }
 0x5c6   :  { %2027 = vmatmul.msk.f32.vlgmr.msra.gmra.mxu1 %vm216_vm1, %v1052_v21 }
 0x5cd   :  { %v1073_v22 = vpop.permute.xlu1 %1072 }
 0x5ce   :  { %2034 = vmatpush.xpose.msk.msrb.mxu1 %vm216_vm1, %v1073_v22 }
 0x5ea   :  { %v1061_v26 = vpop.permute.xlu2 %1060 }
 0x5eb   :  { %2037 = vmatmul.msk.f32.vlgmr.msrb.gmra.mxu2 %vm216_vm1, %v1061_v26 }
 0x5f2   :  { %v1057_v29 = vpop.permute.xlu2 %1056 }
 0x5f3   :  { %2033 = vmatmul.msk.f32.vlgmr.msra.gmra.mxu0 %vm216_vm1, %v1057_v29 }
 0x602   :  { %v1059_v30 = vpop.permute.xlu0 %1058 }
 0x603   :  { %2035 = vmatmul.msk.f32.vlgmr.msrb.gmra.mxu1 %vm216_vm1, %v1059_v30 }
 0x614   :  { %v1213_v31 = vpop.f32.mrf.mxu3 }
 0x615   :  { %v1214_v32 = vadd.f32 %v1213_v31, %v937_v11 }
 0x617   :  { %v1300_v33 = vsel %vm216_vm1, %v1214_v32, -inf }
 0x618   :  { %1301 = vmax.xlane.f32.xlu0 %v1300_v33 }
 0x632   :  { %v1141_v36 = vpop.f32.mrf.mxu0 }
 0x633   :  { %v1142_v38 = vadd.f32 %v1141_v36, %v934_v35 }
 0x635   :  { %v1291_v40 = vsel %vm216_vm1, %v1142_v38, -inf }
 0x636   :  { %1292 = vmax.xlane.f32.xlu1 %v1291_v40  ;;  %v1290_v43 = vpop.xlane.xlu1 %1289 }
 0x637   :  { %v1312_v50 = vsub.f32 %v1118_v19, %v1290_v43 }
 0x639   :  { %v1189_v42 = vpop.f32.mrf.mxu2  ;;  %v1320_v51 = vmul.f32 1.442695, %v1312_v50 }
 0x63a   :  { %v1190_v46 = vadd.f32 %v1189_v42, %v936_v41 }
 0x63b   :  { %2124 = vpow2.f32 %v1320_v51 }
 0x63c   :  { %v1297_v48 = vsel %vm216_vm1, %v1190_v46, -inf }
 0x63d   :  { %1298 = vmax.xlane.f32.xlu2 %v1297_v48 }
 0x641   :  { %v2125_v55 = vpop.eup %2124 }
 0x642   :  { %v1336_v47 = vsel %vm216_vm1, %v2125_v55, 0.0 }
 0x643   :  { %v1165_v39 = vpop.f32.mrf.mxu1 }
 0x644   :  { %v1166_v53 = vadd.f32 %v1165_v39, %v935_v52 }
 0x646   :  { %v1294_v54 = vsel %vm216_vm1, %v1166_v53, -inf }
 0x647   :  { %1295 = vmax.xlane.f32.xlu0 %v1294_v54 }
 0x64f   :  { %1337 = vadd.xlane.f32.xlu0 %v1336_v47  ;;  %v941_v47 = vld [vmem:[%s2788_s7] sm:$0xff] }
 0x663   :  { %1077 = vrot.lane.b32.xlu0 %v2609_v25, %s2191_s25 }
 0x66e   :  { %v1285_v4 = vpop.f32.mrf.mxu2 }
 0x66f   :  { %v1286_v2 = vadd.f32 %v1285_v4, %v940_v1 }
 0x670   :  { %v1237_v57 = vpop.f32.mrf.mxu0 }
 0x671   :  { %v1238_v58 = vadd.f32 %v1237_v57, %v938_v56  ;;  %v1309_v3 = vsel %vm216_vm1, %v1286_v2, -inf }
 0x673   :  { %v1303_v59 = vsel %vm216_vm1, %v1238_v58, -inf }
 0x674   :  { %1304 = vmax.xlane.f32.xlu1 %v1303_v59 }
 0x680   :  { %v1261_v62 = vpop.f32.mrf.mxu1 }
 0x681   :  { %v1262_v63 = vadd.f32 %v1261_v62, %v939_v60 }
 0x683   :  { %v1306_v0 = vsel %vm216_vm1, %v1262_v63, -inf }
 0x684   :  { %1307 = vmax.xlane.f32.xlu2 %v1306_v0 }
 0x68b   :  { %v1302_v12 = vpop.xlane.xlu0 %1301 }
 0x68c   :  { %1310 = vmax.xlane.f32.xlu2 %v1309_v3  ;;  %v1316_v16 = vsub.f32 %v1214_v32, %v1302_v12 }
 0x68e   :  { %v1328_v22 = vmul.f32 1.442695, %v1316_v16 }
 0x6a4   :  { %2080 = vrot.lane.b32.xlu2 %v2079_v49, %s2192_s5 }
 0x6a9   :  { %v1293_v7 = vpop.xlane.xlu1 %1292 }
 0x6aa   :  { %v1313_v8 = vsub.f32 %v1142_v38, %v1293_v7 }
 0x6ac   :  { %v1322_v9 = vmul.f32 1.442695, %v1313_v8 }
 0x6ae   :  { %2126 = vpow2.f32 %v1322_v9 }
 0x6b0   :  { %v1299_v10 = vpop.xlane.xlu2 %1298 }
 0x6b1   :  { %v1315_v5 = vsub.f32 %v1190_v46, %v1299_v10 }
 0x6b3   :  { %v1326_v13 = vmul.f32 1.442695, %v1315_v5  ;;  %v942_v5 = vld [vmem:[%s2788_s7 + $0x8] sm:$0xff] }
 0x6b4   :  { %v2127_v14 = vpop.eup %2126 }
 0x6b5   :  { %2128 = vpow2.f32 %v1326_v13  ;;  %v1339_v15 = vsel %vm216_vm1, %v2127_v14, 0.0 }
 0x6b6   :  { %1340 = vadd.xlane.f32.xlu0 %v1339_v15 }
 0x6ba   :  { %v1296_v17 = vpop.xlane.xlu0 %1295 }
 0x6bb   :  { %v2129_v18 = vpop.eup %2128  ;;  %v1314_v19 = vsub.f32 %v1166_v53, %v1296_v17  ;;  %v944_v17 = vld [vmem:[%s2788_s7 + $0x18] sm:$0xff] }
 0x6bc   :  { %v1345_v20 = vsel %vm216_vm1, %v2129_v18, 0.0 }
 0x6bd   :  { %v1324_v21 = vmul.f32 1.442695, %v1314_v19  ;;  %1346 = vadd.xlane.f32.xlu1 %v1345_v20  ;;  %v945_v19 = vld [vmem:[%s2788_s7 + $0x20] sm:$0xff] }
 0x6bf   :  { %2130 = vpow2.f32 %v1324_v21 }
 0x6c0   :  { %2132 = vpow2.f32 %v1328_v22 }
 0x6c2   :  { %v1338_v23 = vpop.xlane.xlu0 %1337 }
 0x6c3   :  { %2134 = vrcp.f32 %v1338_v23  ;;  %v946_v23 = vld [vmem:[%s2788_s7 + $0x28] sm:$0xff] }
 0x6c5   :  { %v2654_v24 = vpop.eup %2130 }
 0x6c6   :  { %v1342_v26 = vsel %vm216_vm1, %v2654_v24, 0.0  ;;  %v2133_v27 = vpop.eup %2132 }
 0x6c7   :  { %1343 = vadd.xlane.f32.xlu0 %v1342_v26  ;;  %v1348_v11 = vsel %vm216_vm1, %v2133_v27, 0.0 }
 0x6c9   :  { %v2135_v29 = vpop.eup %2134 }
 0x6ca   :  { %v1368_v30 = vmul.f32 %v2135_v29, %v2125_v55  ;;  %v947_v29 = vld [vmem:[%s2788_s7 + $0x30] sm:$0xff] }
 0x6cc   :  { %2038 = vmatmul.msk.f32.vlgmr.msra.gmra.mxu3 %vm216_vm1, %v1368_v30 }
 0x6cd   :  { %1349 = vadd.xlane.f32.xlu2 %v1348_v11  ;;  %1578 = vmatpush.msra.mxu3 %v941_v47 }
 0x6d5   :  { %v1078_v31 = vpop.permute.xlu0 %1077 }
 0x6d6   :  { %1417 = vmatpush.msrb.mxu0 %v1078_v31 }
 0x6db   :  { %1090 = vrot.lane.b32.xlu0 %v2613_v28, %s2190_s24 }
 0x6e5   :  { %1087 = vrot.lane.b32.xlu2 %v2613_v28, %s2191_s25 }
 0x6e7   :  { %v1305_v32 = vpop.xlane.xlu1 %1304 }
 0x6e8   :  { %v1317_v33 = vsub.f32 %v1238_v58, %v1305_v32 }
 0x6ea   :  { %v1330_v35 = vmul.f32 1.442695, %v1317_v33 }
 0x6ec   :  { %2136 = vpow2.f32 %v1330_v35 }
 0x6f2   :  { %v2137_v36 = vpop.eup %2136 }
 0x6f3   :  { %v1351_v38 = vsel %vm216_vm1, %v2137_v36, 0.0 }
 0x6f4   :  { %1352 = vadd.xlane.f32.xlu1 %v1351_v38 }
 0x6f7   :  { %v1308_v40 = vpop.xlane.xlu2 %1307 }
 0x6f8   :  { %v1318_v41 = vsub.f32 %v1262_v63, %v1308_v40  ;;  %v1750_v40 = vperm.slane %v2488_v45, 1 }
 0x6fa   :  { %v1332_v42 = vmul.f32 1.442695, %v1318_v41 }
 0x6fc   :  { %2138 = vpow2.f32 %v1332_v42 }
 0x6ff   :  { %v1311_v43 = vpop.xlane.xlu2 %1310 }
 0x700   :  { %v1319_v46 = vsub.f32 %v1286_v2, %v1311_v43 }
 0x702   :  { %v2139_v48 = vpop.eup %2138  ;;  %v1334_v50 = vmul.f32 1.442695, %v1319_v46 }
 0x703   :  { %v1354_v51 = vsel %vm216_vm1, %v2139_v48, 0.0 }
 0x704   :  { %2140 = vpow2.f32 %v1334_v50  ;;  %1355 = vadd.xlane.f32.xlu1 %v1354_v51 }
 0x707   :  { %v2081_v28 = vpop.permute.xlu2 %2080 }
 0x708   :  { %v2083_v52 = vunpack.i.h.bf16 %v2081_v28  ;;  %v2082_v39 = vunpack.i.l.bf16 %v2081_v28 }
 0x70a   :  { %v2141_v53 = vpop.eup %2140  ;;  %1463 = vmatpush.msra.mxu2 %v2082_v39 }
 0x70b   :  { %v1357_v54 = vsel %vm216_vm1, %v2141_v53, 0.0 }
 0x70c   :  { %1555 = vmatpush.msrb.mxu2 %v2083_v52  ;;  %1358 = vadd.xlane.f32.xlu1 %v1357_v54 }
 0x725   :  { %1080 = vrot.lane.b32.xlu1 %v2609_v25, %s2190_s24 }
 0x729   :  { %v1341_v55 = vpop.xlane.xlu0 %1340 }
 0x72a   :  { %2142 = vrcp.f32 %v1341_v55 }
 0x730   :  { %v2143_v56 = vpop.eup %2142  ;;  %v1347_v57 = vpop.xlane.xlu1 %1346 }
 0x731   :  { %v1369_v58 = vmul.f32 %v2143_v56, %v2127_v14  ;;  %2144 = vrcp.f32 %v1347_v57 }
 0x733   :  { %2039 = vmatmul.msk.f32.vlgmr.msrb.gmra.mxu0 %vm216_vm1, %v1369_v58 }
 0x737   :  { %v2145_v59 = vpop.eup %2144 }
 0x738   :  { %v1371_v60 = vmul.f32 %v2145_v59, %v2129_v18 }
 0x73a   :  { %2041 = vmatmul.msk.f32.vlgmr.msra.gmra.mxu2 %vm216_vm1, %v1371_v60  ;;  %v1344_v10 = vpop.xlane.xlu0 %1343 }
 0x73b   :  { %1647 = vmatpush.msra.mxu2 %v944_v17 }
 0x740   :  { %v1350_v62 = vpop.xlane.xlu2 %1349 }
 0x741   :  { %2146 = vrcp.f32 %v1350_v62 }
 0x747   :  { %v2147_v25 = vpop.eup %2146 }
 0x748   :  { %v1372_v63 = vmul.f32 %v2147_v25, %v2133_v27  ;;  %v1088_v0 = vpop.permute.xlu2 %1087  ;;  %v943_v27 = vld [vmem:[%s2788_s7 + $0x10] sm:$0xff] }
 0x749   :  { %1509 = vmatpush.msra.mxu0 %v1088_v0 }
 0x74a   :  { %2042 = vmatmul.msk.f32.vlgmr.msrb.gmra.mxu3 %vm216_vm1, %v1372_v63 }
 0x74b   :  { %1601 = vmatpush.msrb.mxu0 %v942_v5  ;;  %1670 = vmatpush.msrb.mxu3 %v945_v19 }
 0x74d   :  { %v1091_v15 = vpop.permute.xlu0 %1090 }
 0x74f   :  { %v1396_v1 = vpop.f32.mrf.mxu3 }
 0x752   :  { %2046 = vmatmul.msk.f32.vlgmr.msra.gmra.mxu3 %vm216_vm1, %v1396_v1  ;;  %v1807_v1 = vld [vmem:[%s2790_s9 + $0x10] sm:$0xff] }
 0x767   :  { %v1353_v4 = vpop.xlane.xlu1 %1352 }
 0x768   :  { %2148 = vrcp.f32 %v1353_v4  ;;  %v1806_v4 = vld [vmem:[%s2790_s9 + $0x8] sm:$0xff] }
 0x76e   :  { %v2149_v2 = vpop.eup %2148 }
 0x76f   :  { %v1373_v3 = vmul.f32 %v2149_v2, %v2137_v36  ;;  %v1805_v2 = vld [vmem:[%s2790_s9] sm:$0xff] }
 0x771   :  { %2043 = vmatmul.msk.f32.vlgmr.msra.gmra.mxu0 %vm216_vm1, %v1373_v3 }
 0x772   :  { %1693 = vmatpush.msra.mxu0 %v946_v23 }
 0x777   :  { %v1356_v49 = vpop.xlane.xlu1 %1355 }
 0x77f   :  { %v1359_v7 = vpop.xlane.xlu1 %1358 }
 0x780   :  { %2150 = vrcp.f32 %v1359_v7 }
 0x781   :  { %2152 = vrcp.f32 %v1344_v10  ;;  %v1849_v10 = vld [vmem:[%s2792_s11 + $0x28] sm:$0xff] }
 0x782   :  { %2154 = vrcp.f32 %v1356_v49 }
 0x786   :  { %v2151_v8 = vpop.eup %2150 }
 0x787   :  { %v1375_v9 = vmul.f32 %v2151_v8, %v2141_v53  ;;  %v2153_v12 = vpop.eup %2152  ;;  %v1851_v8 = vld [vmem:[%s2792_s11 + $0x38] sm:$0xff] }
 0x788   :  { %v1370_v13 = vmul.f32 %v2153_v12, %v2654_v24  ;;  %v2155_v16 = vpop.eup %2154  ;;  %v948_v24 = vld [vmem:[%s2788_s7 + $0x38] sm:$0xff] }
 0x789   :  { %2045 = vmatmul.msk.f32.vlgmr.msrb.gmra.mxu2 %vm216_vm1, %v1375_v9  ;;  %v1374_v18 = vmul.f32 %v2155_v16, %v2139_v48  ;;  %v1850_v9 = vld [vmem:[%s2792_s11 + $0x30] sm:$0xff]  ;;  %v1847_v16 = vld [vmem:[%s2792_s11 + $0x18] sm:$0xff] }
 0x78a   :  { %1739 = vmatpush.msrb.mxu2 %v948_v24  ;;  %v1799_v24 = vperm.slane %v2543_v34, 1 }
 0x797   :  { %v1081_v14 = vpop.permute.xlu1 %1080 }
 0x798   :  { %1440 = vmatpush.msra.mxu1 %v1081_v14 }
 0x799   :  { %2040 = vmatmul.msk.f32.vlgmr.msra.gmra.mxu1 %vm216_vm1, %v1370_v13  ;;  %v1848_v13 = vld [vmem:[%s2792_s11 + $0x20] sm:$0xff] }
 0x79a   :  { %1532 = vmatpush.msrb.mxu1 %v1091_v15 }
 0x79c   :  { %1624 = vmatpush.msra.mxu1 %v943_v27 }
 0x7a1   :  { %2044 = vmatmul.msk.f32.vlgmr.msrb.gmra.mxu1 %vm216_vm1, %v1374_v18 }
 0x7a2   :  { %1716 = vmatpush.msrb.mxu1 %v947_v29 }
 0x7b0   :  { %v1419_v20 = vpop.f32.mrf.mxu0 }
 0x7b1   :  { %2047 = vmatmul.msk.f32.vlgmr.msrb.gmra.mxu0 %vm216_vm1, %v1419_v20 }
 0x7b2   :  { %1871 = vmatpush.msrb.mxu0 %v1851_v8 }
 0x7b4   :  { %1872 = vmatpush.msrb.mxu0 %v1850_v9 }
 0x7b6   :  { %1873 = vmatpush.msrb.mxu0 %v1849_v10 }
 0x7b8   :  { %1874 = vmatpush.msrb.mxu0 %v1848_v13 }
 0x7ba   :  { %1875 = vmatpush.msrb.mxu0 %v1847_v16 }
 0x7bd   :  { %v1465_v21 = vpop.f32.mrf.mxu2 }
 0x7be   :  { %2049 = vmatmul.msk.f32.vlgmr.msra.gmra.mxu2 %vm216_vm1, %v1465_v21 }
 0x7cd   :  { %v1488_v22 = vpop.f32.mrf.mxu3 }
 0x7ce   :  { %2050 = vmatmul.msk.f32.vlgmr.msrb.gmra.mxu3 %vm216_vm1, %v1488_v22 }
 0x7d5   :  { %v1580_v33 = vpop.f32.mrf.mxu3 }
 0x7ee   :  { %v1511_v26 = vpop.f32.mrf.mxu0 }
 0x7ef   :  { %2051 = vmatmul.msk.f32.vlgmr.msra.gmra.mxu0 %vm216_vm1, %v1511_v26 }
 0x80c   :  { %v1557_v30 = vpop.f32.mrf.mxu2 }
 0x80d   :  { %2053 = vmatmul.msk.f32.vlgmr.msrb.gmra.mxu2 %vm216_vm1, %v1557_v30  ;;  %v1802_v30 = vperm.slane %v2548_v37, 1 }
 0x816   :  { %v1442_v11 = vpop.f32.mrf.mxu1 }
 0x817   :  { %2048 = vmatmul.msk.f32.vlgmr.msra.gmra.mxu1 %vm216_vm1, %v1442_v11 }
 0x81e   :  { %v1534_v31 = vpop.f32.mrf.mxu1 }
 0x81f   :  { %2052 = vmatmul.msk.f32.vlgmr.msrb.gmra.mxu1 %vm216_vm1, %v1534_v31 }
 0x82e   :  { %v1603_v32 = vpop.f32.mrf.mxu0 }
 0x82f   :  { %v1744_v35 = vadd.f32 %v1603_v32, %v1580_v33 }
 0x841   :  { %v1649_v41 = vpop.f32.mrf.mxu2 }
 0x851   :  { %v1672_v48 = vpop.f32.mrf.mxu3 }
 0x86c   :  { %v1695_v43 = vpop.f32.mrf.mxu0 }
 0x86d   :  { %v1745_v50 = vadd.f32 %v1695_v43, %v1672_v48  ;;  %v1845_v43 = vld [vmem:[%s2792_s11 + $0x8] sm:$0xff]  ;;  %v2084_v48 = vld [vmem:[%s2791_s10] ss:$0 sm:$0xff]  ;;  %s2194_s10 = smov [#allocation2]  }
 0x890   :  { %v1741_v53 = vpop.f32.mrf.mxu2 }
 0x894   :  { %v1626_v36 = vpop.f32.mrf.mxu1 }
 0x895   :  { %v1746_v38 = vadd.f32 %v1744_v35, %v1626_v36 }
 0x897   :  { %v1748_v42 = vadd.f32 %v1746_v38, %v1649_v41 }
 0x899   :  { %v1751_v46 = vadd.f32 %v1750_v40, %v1748_v42  ;;  %v1846_v42 = vld [vmem:[%s2792_s11 + $0x10] sm:$0xff] }
 0x89a   :  { %1876 = vmatpush.msrb.mxu0 %v1846_v42 }
 0x89b   :  { %v1753_v51 = vadd.f32 %v1751_v46, %v2552_v44  ;;  %v1844_v46 = vld [vmem:[%s2792_s11] sm:$0xff]  ;;  %s1944_s11 = sshll.u32 %s2194_s10, 4  ;;  %s1945_s11 = int_to_ptr.vmem [resolvable:$true] %s1944_s11 }
 0x89c   :  { %v1718_v28 = vpop.f32.mrf.mxu1  ;;  %1877 = vmatpush.msrb.mxu0 %v1845_v43 }
 0x89d   :  { %v1747_v52 = vadd.f32 %v1745_v50, %v1718_v28  ;;  %v1755_v39 = vsel %vm80_vm0, %v1753_v51, 0.0 }
 0x89e   :  { %1756 = vadd.xlane.f32.xlu2 %v1755_v39  ;;  %1878 = vmatpush.msrb.mxu0 %v1844_v46 }
 0x89f   :  { %v1749_v54 = vadd.f32 %v1747_v52, %v1741_v53 }
 0x8a1   :  { %v1752_v55 = vadd.f32 %v1750_v40, %v1749_v54  ;;  %v2085_v54 = vld [vmem:[%s2793_s12] ss:$0 sm:$0xff] }
 0x8a3   :  { %v1754_v47 = vadd.f32 %v1752_v55, %v2560_v61  ;;  %v1808_v61 = vld [vmem:[%s2790_s9 + $0x18] sm:$0xff] }
 0x8a4   :  { %1831 = vmatpush.msra.mxu3 %v1808_v61 }
 0x8a5   :  { %v1758_v45 = vsel %vm80_vm0, %v1754_v47, 0.0 }
 0x8a6   :  { %1759 = vadd.xlane.f32.xlu0 %v1758_v45  ;;  %1832 = vmatpush.msra.mxu3 %v1807_v1 }
 0x8a8   :  { %1833 = vmatpush.msra.mxu3 %v1806_v4 }
 0x8aa   :  { %1834 = vmatpush.msra.mxu3 %v1805_v2 }
 0x911   :  { %v1757_v56 = vpop.xlane.xlu2 %1756 }
 0x912   :  { %v1761_v57 = vmul.f32 %v1757_v56, %v2495_v6 }
 0x914   :  { %v1763_v58 = vsub.f32 %v1753_v51, %v1761_v57 }
 0x916   :  { %v1765_v59 = vmul.f32 %v1763_v58, %v1763_v58 }
 0x918   :  { %v1767_v44 = vsel %vm80_vm0, %v1765_v59, 0.0 }
 0x919   :  { %1768 = vadd.xlane.f32.xlu1 %v1767_v44  ;;  %v1760_v60 = vpop.xlane.xlu0 %1759 }
 0x91a   :  { %v1762_v62 = vmul.f32 %v1760_v60, %v2495_v6 }
 0x91c   :  { %v1764_v25 = vsub.f32 %v1754_v47, %v1762_v62 }
 0x91e   :  { %v1766_v63 = vmul.f32 %v1764_v25, %v1764_v25 }
 0x920   :  { %v1770_v0 = vsel %vm80_vm0, %v1766_v63, 0.0 }
 0x921   :  { %1771 = vadd.xlane.f32.xlu2 %v1770_v0 }
 0x98c   :  { %v1769_v3 = vpop.xlane.xlu1 %1768 }
 0x98d   :  { %v1773_v49 = vmul.f32 %v1769_v3, %v2495_v6 }
 0x98f   :  { %v1775_v7 = vadd.f32 1e-05, %v1773_v49 }
 0x991   :  { %2156 = vrsqrt.f32 %v1775_v7  ;;  %vm1783_vm10 = vweird.f32 %v1775_v7 }
 0x994   :  { %v1772_v5 = vpop.xlane.xlu2 %1771 }
 0x995   :  { %v1774_v12 = vmul.f32 %v1772_v5, %v2495_v6 }
 0x997   :  { %v2157_v14 = vpop.eup %2156  ;;  %v1776_v15 = vadd.f32 1e-05, %v1774_v12 }
 0x998   :  { %v1778_v17 = vmul.f32 %v2157_v14, %v1775_v7  ;;  %vm1784_vm9 = vweird.f32 %v2157_v14 }
 0x999   :  { %2158 = vrsqrt.f32 %v1776_v15  ;;  %vm1785_vm11 = vmor %vm1783_vm10, %vm1784_vm9  ;;  %vm1793_vm13 = vweird.f32 %v1776_v15 }
 0x99a   :  { %v1779_v18 = vmul.f32 %v2157_v14, %v1778_v17 }
 0x99c   :  { %v1780_v19 = vmul.f32 0.5, %v1779_v18 }
 0x99e   :  { %v1781_v20 = vsub.f32 1.5, %v1780_v19 }
 0x99f   :  { %v2159_v21 = vpop.eup %2158 }
 0x9a0   :  { %v1782_v22 = vmul.f32 %v2157_v14, %v1781_v20  ;;  %v1788_v23 = vmul.f32 %v2159_v21, %v1776_v15  ;;  %vm1794_vm12 = vweird.f32 %v2159_v21  ;;  %v1932_v20 = vperm.slane %v2543_v34, 2 }
 0x9a1   :  { %vm1795_vm14 = vmor %vm1793_vm13, %vm1794_vm12 }
 0x9a2   :  { %v1786_v26 = vsel %vm1785_vm11, %v2157_v14, %v1782_v22  ;;  %v1789_v27 = vmul.f32 %v2159_v21, %v1788_v23 }
 0x9a3   :  { %v1797_v29 = vmul.f32 %v1786_v26, %v1763_v58 }
 0x9a4   :  { %v1790_v11 = vmul.f32 0.5, %v1789_v27 }
 0x9a5   :  { %v1800_v31 = vmul.f32 %v1799_v24, %v1797_v29 }
 0x9a6   :  { %v1791_v32 = vsub.f32 1.5, %v1790_v11 }
 0x9a7   :  { %v1803_v33 = vadd.f32 %v1802_v30, %v1800_v31 }
 0x9a8   :  { %v1792_v35 = vmul.f32 %v2159_v21, %v1791_v32 }
 0x9a9   :  { %2054 = vmatmul.msk.f32.vlgmr.msra.gmra.mxu3 %vm80_vm0, %v1803_v33 }
 0x9aa   :  { %v1796_v36 = vsel %vm1795_vm14, %v2159_v21, %v1792_v35 }
 0x9ab   :  { %v1798_v38 = vmul.f32 %v1796_v36, %v1764_v25 }
 0x9ad   :  { %v1801_v40 = vmul.f32 %v1799_v24, %v1798_v38 }
 0x9af   :  { %v1804_v41 = vadd.f32 %v1802_v30, %v1801_v40 }
 0x9b1   :  { %2055 = vmatmul.msk.f32.gmra.mxu3 %vm80_vm0, %v1804_v41 }
 0xa2c   :  { %v1836_v50 = vpop.f32.mrf.mxu3 }
 0xa2d   :  { %v1837_v51 = vadd.f32 %v2084_v48, %v1836_v50 }
 0xa2f   :  { %v1842_v28 = vmax.f32 %v1837_v51, 0.0 }
 0xa31   :  { %2056 = vmatmul.msk.f32.vlgmr.msrb.gmra.mxu0 %vm1856_vm15, %v1842_v28 }
 0xa34   :  { %v1839_v52 = vpop.f32.mrf.mxu3 }
 0xa35   :  { %v1840_v39 = vadd.f32 %v2084_v48, %v1839_v52 }
 0xa37   :  { %v1843_v53 = vmax.f32 %v1840_v39, 0.0 }
 0xa39   :  { %2057 = vmatmul.msk.f32.gmra.mxu0 %vm1856_vm15, %v1843_v53 }
 0xaae   :  { %v1880_v55 = vpop.f32.mrf.mxu0 }
 0xaaf   :  { %v1881_v47 = vadd.f32 %v2085_v54, %v1880_v55 }
 0xab1   :  { %v1886_v45 = vadd.f32 %v1881_v47, %v1803_v33 }
 0xab3   :  { %v1888_v56 = vsel %vm80_vm0, %v1886_v45, 0.0 }
 0xab4   :  { %1889 = vadd.xlane.f32.xlu0 %v1888_v56 }
 0xab6   :  { %v1883_v57 = vpop.f32.mrf.mxu0 }
 0xab7   :  { %v1884_v58 = vadd.f32 %v2085_v54, %v1883_v57 }
 0xab9   :  { %v1887_v59 = vadd.f32 %v1884_v58, %v1804_v41 }
 0xabb   :  { %v1891_v44 = vsel %vm80_vm0, %v1887_v59, 0.0 }
 0xabc   :  { %1892 = vadd.xlane.f32.xlu2 %v1891_v44 }
 0xb27   :  { %v1890_v60 = vpop.xlane.xlu0 %1889 }
 0xb28   :  { %v1894_v62 = vmul.f32 %v1890_v60, %v2495_v6 }
 0xb2a   :  { %v1896_v25 = vsub.f32 %v1886_v45, %v1894_v62 }
 0xb2c   :  { %v1898_v63 = vmul.f32 %v1896_v25, %v1896_v25 }
 0xb2e   :  { %v1900_v0 = vsel %vm80_vm0, %v1898_v63, 0.0 }
 0xb2f   :  { %v1893_v61 = vpop.xlane.xlu2 %1892  ;;  %1901 = vadd.xlane.f32.xlu1 %v1900_v0 }
 0xb30   :  { %v1895_v1 = vmul.f32 %v1893_v61, %v2495_v6 }
 0xb32   :  { %v1897_v4 = vsub.f32 %v1887_v59, %v1895_v1 }
 0xb34   :  { %v1899_v2 = vmul.f32 %v1897_v4, %v1897_v4 }
 0xb36   :  { %v1903_v3 = vsel %vm80_vm0, %v1899_v2, 0.0 }
 0xb37   :  { %1904 = vadd.xlane.f32.xlu0 %v1903_v3 }
 0xba2   :  { %v1902_v49 = vpop.xlane.xlu1 %1901 }
 0xba3   :  { %v1906_v7 = vmul.f32 %v1902_v49, %v2495_v6 }
 0xba5   :  { %v1908_v8 = vadd.f32 1e-05, %v1906_v7 }
 0xba7   :  { %2160 = vrsqrt.f32 %v1908_v8  ;;  %vm1916_vm2 = vweird.f32 %v1908_v8 }
 0xbaa   :  { %v1905_v9 = vpop.xlane.xlu0 %1904 }
 0xbab   :  { %v1907_v10 = vmul.f32 %v1905_v9, %v2495_v6  ;;  %v1935_v6 = vperm.slane %v2548_v37, 2 }
 0xbad   :  { %v2161_v5 = vpop.eup %2160  ;;  %v1909_v12 = vadd.f32 1e-05, %v1907_v10 }
 0xbae   :  { %v1911_v13 = vmul.f32 %v2161_v5, %v1908_v8  ;;  %vm1917_vm1 = vweird.f32 %v2161_v5 }
 0xbaf   :  { %2162 = vrsqrt.f32 %v1909_v12  ;;  %vm1918_vm3 = vmor %vm1916_vm2, %vm1917_vm1  ;;  %vm1926_vm5 = vweird.f32 %v1909_v12 }
 0xbb0   :  { %v1912_v14 = vmul.f32 %v2161_v5, %v1911_v13 }
 0xbb2   :  { %v1913_v15 = vmul.f32 0.5, %v1912_v14 }
 0xbb4   :  { %v1914_v16 = vsub.f32 1.5, %v1913_v15 }
 0xbb5   :  { %v2163_v17 = vpop.eup %2162 }
 0xbb6   :  { %v1915_v18 = vmul.f32 %v2161_v5, %v1914_v16  ;;  %v1921_v19 = vmul.f32 %v2163_v17, %v1909_v12  ;;  %vm1927_vm4 = vweird.f32 %v2163_v17 }
 0xbb7   :  { %vm1928_vm6 = vmor %vm1926_vm5, %vm1927_vm4 }
 0xbb8   :  { %v1919_v21 = vsel %vm1918_vm3, %v2161_v5, %v1915_v18  ;;  %v1922_v22 = vmul.f32 %v2163_v17, %v1921_v19 }
 0xbb9   :  { %v1930_v23 = vmul.f32 %v1919_v21, %v1896_v25 }
 0xbba   :  { %v1923_v24 = vmul.f32 0.5, %v1922_v22 }
 0xbbb   :  { %v1933_v26 = vmul.f32 %v1932_v20, %v1930_v23 }
 0xbbc   :  { %v1924_v27 = vsub.f32 1.5, %v1923_v24 }
 0xbbd   :  { %v1936_v29 = vadd.f32 %v1935_v6, %v1933_v26 }
 0xbbe   :  { %v1925_v30 = vmul.f32 %v2163_v17, %v1924_v27 }
 0xbbf   :  { %1938 = vst.msk [vmem:[#allocation2] sm:$0xff] %vm80_vm0, %v1936_v29 }
 0xbc0   :  { %v1929_v11 = vsel %vm1928_vm6, %v2163_v17, %v1925_v30 }
 0xbc1   :  { %v1931_v31 = vmul.f32 %v1929_v11, %v1897_v4 }
 0xbc3   :  { %v1934_v34 = vmul.f32 %v1932_v20, %v1931_v31 }
 0xbc5   :  { %v1937_v37 = vadd.f32 %v1935_v6, %v1934_v34 }
 0xbc7   :  { %1939 = vst.msk [vmem:[#allocation2 + $0x8] sm:$0xff] %vm80_vm0, %v1937_v37 }
 0xbc8   :  { %1952 = dma.vmem_to_hbm [thread:$0]  %s1945_s11, 256, %s1947_s1, [#allocation3], %s2195_s22, %s2195_s22, %s2196_s23  }
 0xbc9   :  { %2188 = dma.done.wait [#allocation3], 256  }
 0xbca   :  { %2189 = vsyncadd [#allocation3], 4294967040 }
 0xbcb   :  { %1957 = vsyncpa [#allocation3], 1 }

</bundles_post_ra>
